<compile_context>
chip_gen: v7x
topology: tpu7x:2x2x1
jax: 0.10.0
libtpu: 0.0.40
codegen_flags: <defaults>
</compile_context>

<pallas_src>
import functools

import numpy as np
import jax
import jax.numpy as jnp
from jax import lax
from jax.experimental import pallas as pl
from jax.experimental.pallas import tpu as pltpu


# ---------------------------------------------------------------------------
# Static interpolation schedule (pure numpy; depends only on T, time_steps).
# torchdiffeq fixed-grid euler with step_size=dt evaluates requested times by
# linear interpolation between grid points.
# ---------------------------------------------------------------------------
def _interp_schedule(T, time_steps):
    dt = float(T) / float(time_steps)
    eval_t = np.linspace(0.0, float(T), time_steps)
    idx = np.clip(np.floor(eval_t / dt), 0, time_steps - 1).astype(np.int64)
    frac = eval_t / dt - idx
    return tuple(int(v) for v in idx), tuple(float(v) for v in frac)


# ---------------------------------------------------------------------------
# Fused kernel.
#   x_ref     : (Bblk, D)          f32   input state block
#   wt_ref    : (K, D, D)          bf16  dt * W_k^T       (dt pre-folded, pre-transposed)
#   b_ref     : (K, 1, D)          f32   dt * b_k
#   wo_ref    : (D, O_pad)         bf16  W_out^T, zero-padded to one 128-lane tile
#   bo_ref    : (1, O_pad)         f32   b_out, zero-padded
#   pred_ref  : (Bblk, O_pad)      f32   Linear(x(T))
#   traj_ref  : (K, Bblk, O_pad)   f32   Linear(interpolated trajectory)
#   states_ref: (K+1, Bblk, D)     f32   VMEM scratch: grid states x_0 .. x_K
#   mat_ref   : ((K+1)*Bblk, D)    f32   VMEM scratch: [features ; traj rows] for one matmul
# ---------------------------------------------------------------------------
def _node_fused_kernel(x_ref, wt_ref, b_ref, wo_ref, bo_ref,
                       pred_ref, traj_ref, states_ref, mat_ref, *,
                       num_steps, unroll, idx, frac):
    K = num_steps
    Bblk = x_ref.shape[0]

    x0 = x_ref[...].astype(jnp.float32)
    states_ref[0] = x0

    # --- serial Euler chain: only the (Bblk,D)x(D,D) recurrence matmul lives here ---
    def body(k, x):
        f = jnp.dot(jnp.tanh(x).astype(jnp.bfloat16), wt_ref[k],
                    preferred_element_type=jnp.float32) + b_ref[k]
        x_new = x + f
        states_ref[k + 1] = x_new          # off-path store; projection happens after the loop
        return x_new

    lax.fori_loop(0, K, body, x0, unroll=unroll)

    # --- assemble [features ; interpolated trajectory] (static compile-time schedule) ---
    mat_ref[0:Bblk, :] = states_ref[K]                       # features = x(T)
    for i in range(K):
        j, f = idx[i], frac[i]
        lo = states_ref[j]
        hi = states_ref[j + 1]
        if f == 0.0:
            row = lo
        elif f == 1.0:
            row = hi
        else:
            row = (1.0 - f) * lo + f * hi
        mat_ref[(i + 1) * Bblk:(i + 2) * Bblk, :] = row

    # --- ONE batched projection, off the critical path (amortizes MXU push/drain) ---
    proj = jnp.dot(mat_ref[...].astype(jnp.bfloat16), wo_ref[...],
                   preferred_element_type=jnp.float32) + bo_ref[...]
    pred_ref[...] = proj[0:Bblk, :]
    for i in range(K):
        traj_ref[i] = proj[(i + 1) * Bblk:(i + 2) * Bblk, :]


# ---------------------------------------------------------------------------
# Full NeuralODE forward (hot path = exactly one pallas_call + two output slices).
# ---------------------------------------------------------------------------
def neural_ode_forward(x, kparams, *, T, time_steps, output_dim):
    B0, D = x.shape
    K = time_steps
    O_pad = kparams["w_out_t_pad"].shape[1]

    # Pad batch up to a multiple of 8 sublanes.
    B = ((B0 + 7) // 8) * 8
    if B != B0:
        x = jnp.pad(x, ((0, B - B0), (0, 0)))

    # v7x: split the batch over both TensorCores once it is large enough.
    b_blk = B // 2 if (B >= 16 and B % 16 == 0) else B
    nb = B // b_blk

    idx, frac = _interp_schedule(T, time_steps)
    kernel = functools.partial(
        _node_fused_kernel,
        num_steps=K,
        unroll=(True if K <= 32 else 8),   # full unroll for small K, partial otherwise
        idx=idx, frac=frac)

    vmem = pltpu.MemorySpace.VMEM
    grid_spec = pltpu.PrefetchScalarGridSpec(
        num_scalar_prefetch=0,
        grid=(nb,),
        in_specs=[
            # batch-blocked activation (VMEM-pipelined by construction)
            pl.BlockSpec((b_blk, D), lambda i: (i, 0)),
            # whole-array VMEM-resident parameters (explicit, non-pipelined)
            pl.BlockSpec(memory_space=vmem),   # w_t_dt  (K, D, D)   bf16
            pl.BlockSpec(memory_space=vmem),   # b_dt    (K, 1, D)   f32
            pl.BlockSpec(memory_space=vmem),   # w_out_t (D, O_pad)  bf16
            pl.BlockSpec(memory_space=vmem),   # b_out   (1, O_pad)  f32
        ],
        out_specs=[
            pl.BlockSpec((b_blk, O_pad), lambda i: (i, 0)),
            pl.BlockSpec((K, b_blk, O_pad), lambda i: (0, i, 0)),
        ],
        scratch_shapes=[
            pltpu.VMEM((K + 1, b_blk, D), jnp.float32),
            pltpu.VMEM(((K + 1) * b_blk, D), jnp.float32),
        ],
    )

    pred_pad, traj_pad = pl.pallas_call(
        kernel,
        grid_spec=grid_spec,
        out_shape=(
            jax.ShapeDtypeStruct((B, O_pad), jnp.float32),
            jax.ShapeDtypeStruct((K, B, O_pad), jnp.float32),
        ),
        compiler_params=pltpu.CompilerParams(
            dimension_semantics=("parallel",)),
    )(x, kparams["w_t_dt"], kparams["b_dt"],
      kparams["w_out_t_pad"], kparams["b_out_pad"])

    # Only remaining XLA ops: strip the lane padding / batch padding.
    pred = pred_pad[:B0, :output_dim]
    proj_traj = traj_pad[:, :B0, :output_dim]
    return pred, proj_traj


# ---------------------------------------------------------------------------
# Pure-JAX reference (faithful to the PyTorch forward).
#   matmul_dtype=bf16 mirrors the operand precision the kernel (and the TPU MXU at
#   default precision) uses, with f32 accumulation; matmul_dtype=f32 uses HIGHEST
#   precision for a strict f32 baseline.
# ---------------------------------------------------------------------------
def reference_forward(x, raw, *, T, time_steps, matmul_dtype=jnp.float32):
    K = time_steps
    dt = float(T) / float(time_steps)
    strict = (jnp.dtype(matmul_dtype) == jnp.dtype(jnp.float32))
    prec = jax.lax.Precision.HIGHEST if strict else jax.lax.Precision.DEFAULT

    w = raw["w"].astype(matmul_dtype)           # (K, H, H)
    w_out_t = raw["w_out"].T.astype(matmul_dtype)   # (H, O)

    cur = x.astype(jnp.float32)
    states = [cur]
    for k in range(K):
        f = jnp.dot(jnp.tanh(cur).astype(matmul_dtype), w[k].T,
                    preferred_element_type=jnp.float32, precision=prec) + raw["b"][k]
        cur = cur + dt * f
        states.append(cur)
    grid = jnp.stack(states, axis=0)            # (K+1, B, D)

    idx, frac = _interp_schedule(T, time_steps)
    fr = jnp.array(frac, dtype=jnp.float32)[:, None, None]
    ix = np.asarray(idx)
    traj = (1.0 - fr) * grid[ix] + fr * grid[ix + 1]   # (K, B, D)

    def lin(z):
        return jnp.dot(z.astype(matmul_dtype), w_out_t,
                       preferred_element_type=jnp.float32, precision=prec) + raw["b_out"]

    return lin(grid[-1]), lin(traj)


# ---------------------------------------------------------------------------
# Raw parameter init (PyTorch nn.Linear layout: uniform(-1/sqrt(in), 1/sqrt(in))).
# ---------------------------------------------------------------------------
def init_raw_params(key, data_dim, hidden_dim, output_dim, time_steps):
    assert data_dim == hidden_dim, "architecture='inside' requires data_dim == hidden_dim"
    K, H, O = time_steps, hidden_dim, output_dim
    k1, k2, k3, k4 = jax.random.split(key, 4)
    bound = 1.0 / jnp.sqrt(H)
    return {
        "w": jax.random.uniform(k1, (K, H, H), jnp.float32, -bound, bound),   # fc2_time[k].weight
        "b": jax.random.uniform(k2, (K, H), jnp.float32, -bound, bound),      # fc2_time[k].bias
        "w_out": jax.random.uniform(k3, (O, H), jnp.float32, -bound, bound),  # linear_layer.weight
        "b_out": jax.random.uniform(k4, (O,), jnp.float32, -bound, bound),    # linear_layer.bias
    }


# ---------------------------------------------------------------------------
# One-time parameter preparation (NOT on the per-call hot path):
#   - transpose per-step weights, fold dt into weights and biases
#   - pre-cast MXU right-hand sides to bf16 (single-pass MXU on all generations)
#   - pre-transpose + lane-pad the output projector to one 128-lane tile
# ---------------------------------------------------------------------------
def prepare_kernel_params(raw, *, T, time_steps, lane=128):
    K = time_steps
    dt = float(T) / float(time_steps)
    w, b = raw["w"], raw["b"]                    # (K,H,H), (K,H)
    w_out, b_out = raw["w_out"], raw["b_out"]    # (O,H), (O,)
    H = w.shape[-1]
    O = w_out.shape[0]
    # Keep O_pad at exactly one 128-lane tile while O <= 128 (v5e: one MXU column pass,
    # one unmasked store); round up to a multiple of 128 otherwise.
    O_pad = max(lane, ((O + lane - 1) // lane) * lane)

    w_out_t_pad = jnp.zeros((H, O_pad), jnp.float32).at[:, :O].set(w_out.T)
    b_out_pad = jnp.zeros((1, O_pad), jnp.float32).at[:, :O].set(b_out[None, :])

    return {
        "w_t_dt": (dt * jnp.transpose(w, (0, 2, 1))).astype(jnp.bfloat16),  # (K,H,H) = dt*W^T
        "b_dt": (dt * b).reshape(K, 1, H).astype(jnp.float32),              # (K,1,H)
        "w_out_t_pad": w_out_t_pad.astype(jnp.bfloat16),                    # (H,O_pad)
        "b_out_pad": b_out_pad,                                             # (1,O_pad) f32
    }


if __name__ == "__main__":
    B = 8
    data_dim = hidden_dim = 32
    output_dim = 2
    T = 10
    time_steps = 10

    key = jax.random.PRNGKey(0)
    kx, kp = jax.random.split(key)
    x = jax.random.normal(kx, (B, data_dim), jnp.float32)

    raw_params = init_raw_params(kp, data_dim, hidden_dim, output_dim, time_steps)
    kparams = prepare_kernel_params(raw_params, T=T, time_steps=time_steps)
    kparams = jax.tree_util.tree_map(jax.block_until_ready, kparams)

    fwd = jax.jit(functools.partial(
        neural_ode_forward, T=T, time_steps=time_steps, output_dim=output_dim))

    pred, proj_traj = fwd(x, kparams)
    pred = jax.block_until_ready(pred)
    proj_traj = jax.block_until_ready(proj_traj)

    assert pred.shape == (B, output_dim)
    assert proj_traj.shape == (time_steps, B, output_dim)

    # (a) matched-precision reference (bf16 MXU operands, f32 accumulation) — tight check.
    pred_bf, traj_bf = reference_forward(
        x, raw_params, T=T, time_steps=time_steps, matmul_dtype=jnp.bfloat16)
    assert jnp.allclose(pred, pred_bf, atol=2e-3, rtol=2e-3)
    assert jnp.allclose(proj_traj, traj_bf, atol=2e-3, rtol=2e-3)

    # (b) strict f32 reference (exact PyTorch math) — difference is bounded by the bf16
    #     operand rounding that the TPU MXU applies to f32 matmuls at default precision.
    pred_32, traj_32 = reference_forward(
        x, raw_params, T=T, time_steps=time_steps, matmul_dtype=jnp.float32)
    assert jnp.allclose(pred, pred_32, atol=5e-2, rtol=5e-2)
    assert jnp.allclose(proj_traj, traj_32, atol=5e-2, rtol=5e-2)

    print("KERNEL_OK")
</pallas_src>

<mosaic_0001>
module attributes {stable_mosaic.version = 11 : i64} {
  func.func @_node_fused_kernel(%arg0: i32, %arg1: memref<8x32xf32, #tpu.memory_space<vmem>>, %arg2: memref<10x32x32xbf16, #tpu.memory_space<vmem>>, %arg3: memref<10x1x32xf32, #tpu.memory_space<vmem>>, %arg4: memref<32x128xbf16, #tpu.memory_space<vmem>>, %arg5: memref<1x128xf32, #tpu.memory_space<vmem>>, %arg6: memref<8x128xf32, #tpu.memory_space<vmem>>, %arg7: memref<10x8x128xf32, #tpu.memory_space<vmem>>, %arg8: memref<11x8x32xf32, #tpu.memory_space<vmem>>, %arg9: memref<88x32xf32, #tpu.memory_space<vmem>>) attributes {dimension_semantics = [#tpu.dimension_semantics<parallel>], iteration_bounds = array<i64: 1>, scalar_prefetch = 0 : i64, scratch_operands = 2 : i64, tpu.core_type = #tpu.core_type<tc>, window_params = [{transform_indices = @transform_0, window_bounds = array<i64: 8, 32>}, {pipeline_mode = #tpu.pipeline_mode<synchronous>, transform_indices = @transform_1, window_bounds = array<i64: 10, 32, 32>}, {pipeline_mode = #tpu.pipeline_mode<synchronous>, transform_indices = @transform_2, window_bounds = array<i64: 10, 1, 32>}, {pipeline_mode = #tpu.pipeline_mode<synchronous>, transform_indices = @transform_3, window_bounds = array<i64: 32, 128>}, {pipeline_mode = #tpu.pipeline_mode<synchronous>, transform_indices = @transform_4, window_bounds = array<i64: 1, 128>}, {transform_indices = @transform_5, window_bounds = array<i64: 8, 128>}, {transform_indices = @transform_6, window_bounds = array<i64: 10, 8, 128>}]} {
    %c0 = arith.constant 0 : index
    %c0_0 = arith.constant 0 : index
    %0 = vector.load %arg1[%c0, %c0_0] : memref<8x32xf32, #tpu.memory_space<vmem>>, vector<8x32xf32>
    %c0_1 = arith.constant 0 : index
    %c0_2 = arith.constant 0 : index
    %c0_3 = arith.constant 0 : index
    %1 = vector.load %arg8[%c0_1, %c0_2, %c0_3] : memref<11x8x32xf32, #tpu.memory_space<vmem>>, vector<1x8x32xf32>
    %2 = vector.shape_cast %1 : vector<1x8x32xf32> to vector<8x32xf32>
    %3 = vector.shape_cast %0 : vector<8x32xf32> to vector<1x8x32xf32>
    tpu.vector_store %arg8[%c0_1, %c0_2, %c0_3], %3 {strides = array<i32>} : memref<11x8x32xf32, #tpu.memory_space<vmem>>, vector<1x8x32xf32>,
    %c0_i32 = arith.constant 0 : i32
    %4 = math.tanh %0 : vector<8x32xf32>
    %5 = arith.truncf %4 : vector<8x32xf32> to vector<8x32xbf16>
    %6 = arith.index_cast %c0_i32 : i32 to index
    %c0_4 = arith.constant 0 : index
    %c0_5 = arith.constant 0 : index
    %7 = vector.load %arg2[%6, %c0_4, %c0_5] : memref<10x32x32xbf16, #tpu.memory_space<vmem>>, vector<1x32x32xbf16>
    %8 = vector.shape_cast %7 : vector<1x32x32xbf16> to vector<32x32xbf16>
    %cst = arith.constant dense<0.000000e+00> : vector<8x32xf32>
    %9 = tpu.matmul %5, %8, %cst {dimension_numbers = #tpu.dot_dimension_numbers<[1], [0], [0], [1], [0, 0, 1, 1], [], []>} : vector<8x32xbf16>, vector<32x32xbf16>, vector<8x32xf32> -> vector<8x32xf32>
    %10 = arith.index_cast %c0_i32 : i32 to index
    %c0_6 = arith.constant 0 : index
    %c0_7 = arith.constant 0 : index
    %11 = vector.load %arg3[%10, %c0_6, %c0_7] : memref<10x1x32xf32, #tpu.memory_space<vmem>>, vector<1x1x32xf32>
    %12 = vector.shape_cast %11 : vector<1x1x32xf32> to vector<1x32xf32>
    %13 = vector.broadcast %12 : vector<1x32xf32> to vector<8x32xf32>
    %14 = arith.addf %9, %13 : vector<8x32xf32>
    %15 = arith.addf %0, %14 : vector<8x32xf32>
    %c1_i32 = arith.constant 1 : i32
    %16 = arith.addi %c0_i32, %c1_i32 : i32
    %17 = arith.index_cast %16 : i32 to index
    %c0_8 = arith.constant 0 : index
    %c0_9 = arith.constant 0 : index
    %18 = vector.load %arg8[%17, %c0_8, %c0_9] : memref<11x8x32xf32, #tpu.memory_space<vmem>>, vector<1x8x32xf32>
    %19 = vector.shape_cast %18 : vector<1x8x32xf32> to vector<8x32xf32>
    %20 = vector.shape_cast %15 : vector<8x32xf32> to vector<1x8x32xf32>
    tpu.vector_store %arg8[%17, %c0_8, %c0_9], %20 {strides = array<i32>} : memref<11x8x32xf32, #tpu.memory_space<vmem>>, vector<1x8x32xf32>,
    %c1_i32_10 = arith.constant 1 : i32
    %21 = math.tanh %15 : vector<8x32xf32>
    %22 = arith.truncf %21 : vector<8x32xf32> to vector<8x32xbf16>
    %23 = arith.index_cast %c1_i32_10 : i32 to index
    %c0_11 = arith.constant 0 : index
    %c0_12 = arith.constant 0 : index
    %24 = vector.load %arg2[%23, %c0_11, %c0_12] : memref<10x32x32xbf16, #tpu.memory_space<vmem>>, vector<1x32x32xbf16>
    %25 = vector.shape_cast %24 : vector<1x32x32xbf16> to vector<32x32xbf16>
    %cst_13 = arith.constant dense<0.000000e+00> : vector<8x32xf32>
    %26 = tpu.matmul %22, %25, %cst_13 {dimension_numbers = #tpu.dot_dimension_numbers<[1], [0], [0], [1], [0, 0, 1, 1], [], []>} : vector<8x32xbf16>, vector<32x32xbf16>, vector<8x32xf32> -> vector<8x32xf32>
    %27 = arith.index_cast %c1_i32_10 : i32 to index
    %c0_14 = arith.constant 0 : index
    %c0_15 = arith.constant 0 : index
    %28 = vector.load %arg3[%27, %c0_14, %c0_15] : memref<10x1x32xf32, #tpu.memory_space<vmem>>, vector<1x1x32xf32>
    %29 = vector.shape_cast %28 : vector<1x1x32xf32> to vector<1x32xf32>
    %30 = vector.broadcast %29 : vector<1x32xf32> to vector<8x32xf32>
    %31 = arith.addf %26, %30 : vector<8x32xf32>
    %32 = arith.addf %15, %31 : vector<8x32xf32>
    %c1_i32_16 = arith.constant 1 : i32
    %33 = arith.addi %c1_i32_10, %c1_i32_16 : i32
    %34 = arith.index_cast %33 : i32 to index
    %c0_17 = arith.constant 0 : index
    %c0_18 = arith.constant 0 : index
    %35 = vector.load %arg8[%34, %c0_17, %c0_18] : memref<11x8x32xf32, #tpu.memory_space<vmem>>, vector<1x8x32xf32>
    %36 = vector.shape_cast %35 : vector<1x8x32xf32> to vector<8x32xf32>
    %37 = vector.shape_cast %32 : vector<8x32xf32> to vector<1x8x32xf32>
    tpu.vector_store %arg8[%34, %c0_17, %c0_18], %37 {strides = array<i32>} : memref<11x8x32xf32, #tpu.memory_space<vmem>>, vector<1x8x32xf32>,
    %c2_i32 = arith.constant 2 : i32
    %38 = math.tanh %32 : vector<8x32xf32>
    %39 = arith.truncf %38 : vector<8x32xf32> to vector<8x32xbf16>
    %40 = arith.index_cast %c2_i32 : i32 to index
    %c0_19 = arith.constant 0 : index
    %c0_20 = arith.constant 0 : index
    %41 = vector.load %arg2[%40, %c0_19, %c0_20] : memref<10x32x32xbf16, #tpu.memory_space<vmem>>, vector<1x32x32xbf16>
    %42 = vector.shape_cast %41 : vector<1x32x32xbf16> to vector<32x32xbf16>
    %cst_21 = arith.constant dense<0.000000e+00> : vector<8x32xf32>
    %43 = tpu.matmul %39, %42, %cst_21 {dimension_numbers = #tpu.dot_dimension_numbers<[1], [0], [0], [1], [0, 0, 1, 1], [], []>} : vector<8x32xbf16>, vector<32x32xbf16>, vector<8x32xf32> -> vector<8x32xf32>
    %44 = arith.index_cast %c2_i32 : i32 to index
    %c0_22 = arith.constant 0 : index
    %c0_23 = arith.constant 0 : index
    %45 = vector.load %arg3[%44, %c0_22, %c0_23] : memref<10x1x32xf32, #tpu.memory_space<vmem>>, vector<1x1x32xf32>
    %46 = vector.shape_cast %45 : vector<1x1x32xf32> to vector<1x32xf32>
    %47 = vector.broadcast %46 : vector<1x32xf32> to vector<8x32xf32>
    %48 = arith.addf %43, %47 : vector<8x32xf32>
    %49 = arith.addf %32, %48 : vector<8x32xf32>
    %c1_i32_24 = arith.constant 1 : i32
    %50 = arith.addi %c2_i32, %c1_i32_24 : i32
    %51 = arith.index_cast %50 : i32 to index
    %c0_25 = arith.constant 0 : index
    %c0_26 = arith.constant 0 : index
    %52 = vector.load %arg8[%51, %c0_25, %c0_26] : memref<11x8x32xf32, #tpu.memory_space<vmem>>, vector<1x8x32xf32>
    %53 = vector.shape_cast %52 : vector<1x8x32xf32> to vector<8x32xf32>
    %54 = vector.shape_cast %49 : vector<8x32xf32> to vector<1x8x32xf32>
    tpu.vector_store %arg8[%51, %c0_25, %c0_26], %54 {strides = array<i32>} : memref<11x8x32xf32, #tpu.memory_space<vmem>>, vector<1x8x32xf32>,
    %c3_i32 = arith.constant 3 : i32
    %55 = math.tanh %49 : vector<8x32xf32>
    %56 = arith.truncf %55 : vector<8x32xf32> to vector<8x32xbf16>
    %57 = arith.index_cast %c3_i32 : i32 to index
    %c0_27 = arith.constant 0 : index
    %c0_28 = arith.constant 0 : index
    %58 = vector.load %arg2[%57, %c0_27, %c0_28] : memref<10x32x32xbf16, #tpu.memory_space<vmem>>, vector<1x32x32xbf16>
    %59 = vector.shape_cast %58 : vector<1x32x32xbf16> to vector<32x32xbf16>
    %cst_29 = arith.constant dense<0.000000e+00> : vector<8x32xf32>
    %60 = tpu.matmul %56, %59, %cst_29 {dimension_numbers = #tpu.dot_dimension_numbers<[1], [0], [0], [1], [0, 0, 1, 1], [], []>} : vector<8x32xbf16>, vector<32x32xbf16>, vector<8x32xf32> -> vector<8x32xf32>
    %61 = arith.index_cast %c3_i32 : i32 to index
    %c0_30 = arith.constant 0 : index
    %c0_31 = arith.constant 0 : index
    %62 = vector.load %arg3[%61, %c0_30, %c0_31] : memref<10x1x32xf32, #tpu.memory_space<vmem>>, vector<1x1x32xf32>
    %63 = vector.shape_cast %62 : vector<1x1x32xf32> to vector<1x32xf32>
    %64 = vector.broadcast %63 : vector<1x32xf32> to vector<8x32xf32>
    %65 = arith.addf %60, %64 : vector<8x32xf32>
    %66 = arith.addf %49, %65 : vector<8x32xf32>
    %c1_i32_32 = arith.constant 1 : i32
    %67 = arith.addi %c3_i32, %c1_i32_32 : i32
    %68 = arith.index_cast %67 : i32 to index
    %c0_33 = arith.constant 0 : index
    %c0_34 = arith.constant 0 : index
    %69 = vector.load %arg8[%68, %c0_33, %c0_34] : memref<11x8x32xf32, #tpu.memory_space<vmem>>, vector<1x8x32xf32>
    %70 = vector.shape_cast %69 : vector<1x8x32xf32> to vector<8x32xf32>
    %71 = vector.shape_cast %66 : vector<8x32xf32> to vector<1x8x32xf32>
    tpu.vector_store %arg8[%68, %c0_33, %c0_34], %71 {strides = array<i32>} : memref<11x8x32xf32, #tpu.memory_space<vmem>>, vector<1x8x32xf32>,
    %c4_i32 = arith.constant 4 : i32
    %72 = math.tanh %66 : vector<8x32xf32>
    %73 = arith.truncf %72 : vector<8x32xf32> to vector<8x32xbf16>
    %74 = arith.index_cast %c4_i32 : i32 to index
    %c0_35 = arith.constant 0 : index
    %c0_36 = arith.constant 0 : index
    %75 = vector.load %arg2[%74, %c0_35, %c0_36] : memref<10x32x32xbf16, #tpu.memory_space<vmem>>, vector<1x32x32xbf16>
    %76 = vector.shape_cast %75 : vector<1x32x32xbf16> to vector<32x32xbf16>
    %cst_37 = arith.constant dense<0.000000e+00> : vector<8x32xf32>
    %77 = tpu.matmul %73, %76, %cst_37 {dimension_numbers = #tpu.dot_dimension_numbers<[1], [0], [0], [1], [0, 0, 1, 1], [], []>} : vector<8x32xbf16>, vector<32x32xbf16>, vector<8x32xf32> -> vector<8x32xf32>
    %78 = arith.index_cast %c4_i32 : i32 to index
    %c0_38 = arith.constant 0 : index
    %c0_39 = arith.constant 0 : index
    %79 = vector.load %arg3[%78, %c0_38, %c0_39] : memref<10x1x32xf32, #tpu.memory_space<vmem>>, vector<1x1x32xf32>
    %80 = vector.shape_cast %79 : vector<1x1x32xf32> to vector<1x32xf32>
    %81 = vector.broadcast %80 : vector<1x32xf32> to vector<8x32xf32>
    %82 = arith.addf %77, %81 : vector<8x32xf32>
    %83 = arith.addf %66, %82 : vector<8x32xf32>
    %c1_i32_40 = arith.constant 1 : i32
    %84 = arith.addi %c4_i32, %c1_i32_40 : i32
    %85 = arith.index_cast %84 : i32 to index
    %c0_41 = arith.constant 0 : index
    %c0_42 = arith.constant 0 : index
    %86 = vector.load %arg8[%85, %c0_41, %c0_42] : memref<11x8x32xf32, #tpu.memory_space<vmem>>, vector<1x8x32xf32>
    %87 = vector.shape_cast %86 : vector<1x8x32xf32> to vector<8x32xf32>
    %88 = vector.shape_cast %83 : vector<8x32xf32> to vector<1x8x32xf32>
    tpu.vector_store %arg8[%85, %c0_41, %c0_42], %88 {strides = array<i32>} : memref<11x8x32xf32, #tpu.memory_space<vmem>>, vector<1x8x32xf32>,
    %c5_i32 = arith.constant 5 : i32
    %89 = math.tanh %83 : vector<8x32xf32>
    %90 = arith.truncf %89 : vector<8x32xf32> to vector<8x32xbf16>
    %91 = arith.index_cast %c5_i32 : i32 to index
    %c0_43 = arith.constant 0 : index
    %c0_44 = arith.constant 0 : index
    %92 = vector.load %arg2[%91, %c0_43, %c0_44] : memref<10x32x32xbf16, #tpu.memory_space<vmem>>, vector<1x32x32xbf16>
    %93 = vector.shape_cast %92 : vector<1x32x32xbf16> to vector<32x32xbf16>
    %cst_45 = arith.constant dense<0.000000e+00> : vector<8x32xf32>
    %94 = tpu.matmul %90, %93, %cst_45 {dimension_numbers = #tpu.dot_dimension_numbers<[1], [0], [0], [1], [0, 0, 1, 1], [], []>} : vector<8x32xbf16>, vector<32x32xbf16>, vector<8x32xf32> -> vector<8x32xf32>
    %95 = arith.index_cast %c5_i32 : i32 to index
    %c0_46 = arith.constant 0 : index
    %c0_47 = arith.constant 0 : index
    %96 = vector.load %arg3[%95, %c0_46, %c0_47] : memref<10x1x32xf32, #tpu.memory_space<vmem>>, vector<1x1x32xf32>
    %97 = vector.shape_cast %96 : vector<1x1x32xf32> to vector<1x32xf32>
    %98 = vector.broadcast %97 : vector<1x32xf32> to vector<8x32xf32>
    %99 = arith.addf %94, %98 : vector<8x32xf32>
    %100 = arith.addf %83, %99 : vector<8x32xf32>
    %c1_i32_48 = arith.constant 1 : i32
    %101 = arith.addi %c5_i32, %c1_i32_48 : i32
    %102 = arith.index_cast %101 : i32 to index
    %c0_49 = arith.constant 0 : index
    %c0_50 = arith.constant 0 : index
    %103 = vector.load %arg8[%102, %c0_49, %c0_50] : memref<11x8x32xf32, #tpu.memory_space<vmem>>, vector<1x8x32xf32>
    %104 = vector.shape_cast %103 : vector<1x8x32xf32> to vector<8x32xf32>
    %105 = vector.shape_cast %100 : vector<8x32xf32> to vector<1x8x32xf32>
    tpu.vector_store %arg8[%102, %c0_49, %c0_50], %105 {strides = array<i32>} : memref<11x8x32xf32, #tpu.memory_space<vmem>>, vector<1x8x32xf32>,
    %c6_i32 = arith.constant 6 : i32
    %106 = math.tanh %100 : vector<8x32xf32>
    %107 = arith.truncf %106 : vector<8x32xf32> to vector<8x32xbf16>
    %108 = arith.index_cast %c6_i32 : i32 to index
    %c0_51 = arith.constant 0 : index
    %c0_52 = arith.constant 0 : index
    %109 = vector.load %arg2[%108, %c0_51, %c0_52] : memref<10x32x32xbf16, #tpu.memory_space<vmem>>, vector<1x32x32xbf16>
    %110 = vector.shape_cast %109 : vector<1x32x32xbf16> to vector<32x32xbf16>
    %cst_53 = arith.constant dense<0.000000e+00> : vector<8x32xf32>
    %111 = tpu.matmul %107, %110, %cst_53 {dimension_numbers = #tpu.dot_dimension_numbers<[1], [0], [0], [1], [0, 0, 1, 1], [], []>} : vector<8x32xbf16>, vector<32x32xbf16>, vector<8x32xf32> -> vector<8x32xf32>
    %112 = arith.index_cast %c6_i32 : i32 to index
    %c0_54 = arith.constant 0 : index
    %c0_55 = arith.constant 0 : index
    %113 = vector.load %arg3[%112, %c0_54, %c0_55] : memref<10x1x32xf32, #tpu.memory_space<vmem>>, vector<1x1x32xf32>
    %114 = vector.shape_cast %113 : vector<1x1x32xf32> to vector<1x32xf32>
    %115 = vector.broadcast %114 : vector<1x32xf32> to vector<8x32xf32>
    %116 = arith.addf %111, %115 : vector<8x32xf32>
    %117 = arith.addf %100, %116 : vector<8x32xf32>
    %c1_i32_56 = arith.constant 1 : i32
    %118 = arith.addi %c6_i32, %c1_i32_56 : i32
    %119 = arith.index_cast %118 : i32 to index
    %c0_57 = arith.constant 0 : index
    %c0_58 = arith.constant 0 : index
    %120 = vector.load %arg8[%119, %c0_57, %c0_58] : memref<11x8x32xf32, #tpu.memory_space<vmem>>, vector<1x8x32xf32>
    %121 = vector.shape_cast %120 : vector<1x8x32xf32> to vector<8x32xf32>
    %122 = vector.shape_cast %117 : vector<8x32xf32> to vector<1x8x32xf32>
    tpu.vector_store %arg8[%119, %c0_57, %c0_58], %122 {strides = array<i32>} : memref<11x8x32xf32, #tpu.memory_space<vmem>>, vector<1x8x32xf32>,
    %c7_i32 = arith.constant 7 : i32
    %123 = math.tanh %117 : vector<8x32xf32>
    %124 = arith.truncf %123 : vector<8x32xf32> to vector<8x32xbf16>
    %125 = arith.index_cast %c7_i32 : i32 to index
    %c0_59 = arith.constant 0 : index
    %c0_60 = arith.constant 0 : index
    %126 = vector.load %arg2[%125, %c0_59, %c0_60] : memref<10x32x32xbf16, #tpu.memory_space<vmem>>, vector<1x32x32xbf16>
    %127 = vector.shape_cast %126 : vector<1x32x32xbf16> to vector<32x32xbf16>
    %cst_61 = arith.constant dense<0.000000e+00> : vector<8x32xf32>
    %128 = tpu.matmul %124, %127, %cst_61 {dimension_numbers = #tpu.dot_dimension_numbers<[1], [0], [0], [1], [0, 0, 1, 1], [], []>} : vector<8x32xbf16>, vector<32x32xbf16>, vector<8x32xf32> -> vector<8x32xf32>
    %129 = arith.index_cast %c7_i32 : i32 to index
    %c0_62 = arith.constant 0 : index
    %c0_63 = arith.constant 0 : index
    %130 = vector.load %arg3[%129, %c0_62, %c0_63] : memref<10x1x32xf32, #tpu.memory_space<vmem>>, vector<1x1x32xf32>
    %131 = vector.shape_cast %130 : vector<1x1x32xf32> to vector<1x32xf32>
    %132 = vector.broadcast %131 : vector<1x32xf32> to vector<8x32xf32>
    %133 = arith.addf %128, %132 : vector<8x32xf32>
    %134 = arith.addf %117, %133 : vector<8x32xf32>
    %c1_i32_64 = arith.constant 1 : i32
    %135 = arith.addi %c7_i32, %c1_i32_64 : i32
    %136 = arith.index_cast %135 : i32 to index
    %c0_65 = arith.constant 0 : index
    %c0_66 = arith.constant 0 : index
    %137 = vector.load %arg8[%136, %c0_65, %c0_66] : memref<11x8x32xf32, #tpu.memory_space<vmem>>, vector<1x8x32xf32>
    %138 = vector.shape_cast %137 : vector<1x8x32xf32> to vector<8x32xf32>
    %139 = vector.shape_cast %134 : vector<8x32xf32> to vector<1x8x32xf32>
    tpu.vector_store %arg8[%136, %c0_65, %c0_66], %139 {strides = array<i32>} : memref<11x8x32xf32, #tpu.memory_space<vmem>>, vector<1x8x32xf32>,
    %c8_i32 = arith.constant 8 : i32
    %140 = math.tanh %134 : vector<8x32xf32>
    %141 = arith.truncf %140 : vector<8x32xf32> to vector<8x32xbf16>
    %142 = arith.index_cast %c8_i32 : i32 to index
    %c0_67 = arith.constant 0 : index
    %c0_68 = arith.constant 0 : index
    %143 = vector.load %arg2[%142, %c0_67, %c0_68] : memref<10x32x32xbf16, #tpu.memory_space<vmem>>, vector<1x32x32xbf16>
    %144 = vector.shape_cast %143 : vector<1x32x32xbf16> to vector<32x32xbf16>
    %cst_69 = arith.constant dense<0.000000e+00> : vector<8x32xf32>
    %145 = tpu.matmul %141, %144, %cst_69 {dimension_numbers = #tpu.dot_dimension_numbers<[1], [0], [0], [1], [0, 0, 1, 1], [], []>} : vector<8x32xbf16>, vector<32x32xbf16>, vector<8x32xf32> -> vector<8x32xf32>
    %146 = arith.index_cast %c8_i32 : i32 to index
    %c0_70 = arith.constant 0 : index
    %c0_71 = arith.constant 0 : index
    %147 = vector.load %arg3[%146, %c0_70, %c0_71] : memref<10x1x32xf32, #tpu.memory_space<vmem>>, vector<1x1x32xf32>
    %148 = vector.shape_cast %147 : vector<1x1x32xf32> to vector<1x32xf32>
    %149 = vector.broadcast %148 : vector<1x32xf32> to vector<8x32xf32>
    %150 = arith.addf %145, %149 : vector<8x32xf32>
    %151 = arith.addf %134, %150 : vector<8x32xf32>
    %c1_i32_72 = arith.constant 1 : i32
    %152 = arith.addi %c8_i32, %c1_i32_72 : i32
    %153 = arith.index_cast %152 : i32 to index
    %c0_73 = arith.constant 0 : index
    %c0_74 = arith.constant 0 : index
    %154 = vector.load %arg8[%153, %c0_73, %c0_74] : memref<11x8x32xf32, #tpu.memory_space<vmem>>, vector<1x8x32xf32>
    %155 = vector.shape_cast %154 : vector<1x8x32xf32> to vector<8x32xf32>
    %156 = vector.shape_cast %151 : vector<8x32xf32> to vector<1x8x32xf32>
    tpu.vector_store %arg8[%153, %c0_73, %c0_74], %156 {strides = array<i32>} : memref<11x8x32xf32, #tpu.memory_space<vmem>>, vector<1x8x32xf32>,
    %c9_i32 = arith.constant 9 : i32
    %157 = math.tanh %151 : vector<8x32xf32>
    %158 = arith.truncf %157 : vector<8x32xf32> to vector<8x32xbf16>
    %159 = arith.index_cast %c9_i32 : i32 to index
    %c0_75 = arith.constant 0 : index
    %c0_76 = arith.constant 0 : index
    %160 = vector.load %arg2[%159, %c0_75, %c0_76] : memref<10x32x32xbf16, #tpu.memory_space<vmem>>, vector<1x32x32xbf16>
    %161 = vector.shape_cast %160 : vector<1x32x32xbf16> to vector<32x32xbf16>
    %cst_77 = arith.constant dense<0.000000e+00> : vector<8x32xf32>
    %162 = tpu.matmul %158, %161, %cst_77 {dimension_numbers = #tpu.dot_dimension_numbers<[1], [0], [0], [1], [0, 0, 1, 1], [], []>} : vector<8x32xbf16>, vector<32x32xbf16>, vector<8x32xf32> -> vector<8x32xf32>
    %163 = arith.index_cast %c9_i32 : i32 to index
    %c0_78 = arith.constant 0 : index
    %c0_79 = arith.constant 0 : index
    %164 = vector.load %arg3[%163, %c0_78, %c0_79] : memref<10x1x32xf32, #tpu.memory_space<vmem>>, vector<1x1x32xf32>
    %165 = vector.shape_cast %164 : vector<1x1x32xf32> to vector<1x32xf32>
    %166 = vector.broadcast %165 : vector<1x32xf32> to vector<8x32xf32>
    %167 = arith.addf %162, %166 : vector<8x32xf32>
    %168 = arith.addf %151, %167 : vector<8x32xf32>
    %c1_i32_80 = arith.constant 1 : i32
    %169 = arith.addi %c9_i32, %c1_i32_80 : i32
    %170 = arith.index_cast %169 : i32 to index
    %c0_81 = arith.constant 0 : index
    %c0_82 = arith.constant 0 : index
    %171 = vector.load %arg8[%170, %c0_81, %c0_82] : memref<11x8x32xf32, #tpu.memory_space<vmem>>, vector<1x8x32xf32>
    %172 = vector.shape_cast %171 : vector<1x8x32xf32> to vector<8x32xf32>
    %173 = vector.shape_cast %168 : vector<8x32xf32> to vector<1x8x32xf32>
    tpu.vector_store %arg8[%170, %c0_81, %c0_82], %173 {strides = array<i32>} : memref<11x8x32xf32, #tpu.memory_space<vmem>>, vector<1x8x32xf32>,
    %c10_i32 = arith.constant 10 : i32
    %c10 = arith.constant 10 : index
    %c0_83 = arith.constant 0 : index
    %c0_84 = arith.constant 0 : index
    %174 = vector.load %arg8[%c10, %c0_83, %c0_84] : memref<11x8x32xf32, #tpu.memory_space<vmem>>, vector<1x8x32xf32>
    %175 = vector.shape_cast %174 : vector<1x8x32xf32> to vector<8x32xf32>
    %c0_85 = arith.constant 0 : index
    %c0_86 = arith.constant 0 : index
    %176 = vector.load %arg9[%c0_85, %c0_86] : memref<88x32xf32, #tpu.memory_space<vmem>>, vector<8x32xf32>
    tpu.vector_store %arg9[%c0_85, %c0_86], %175 {strides = array<i32>} : memref<88x32xf32, #tpu.memory_space<vmem>>, vector<8x32xf32>,
    %c0_87 = arith.constant 0 : index
    %c0_88 = arith.constant 0 : index
    %c0_89 = arith.constant 0 : index
    %177 = vector.load %arg8[%c0_87, %c0_88, %c0_89] : memref<11x8x32xf32, #tpu.memory_space<vmem>>, vector<1x8x32xf32>
    %178 = vector.shape_cast %177 : vector<1x8x32xf32> to vector<8x32xf32>
    %c8 = arith.constant 8 : index
    %c0_90 = arith.constant 0 : index
    %179 = vector.load %arg9[%c8, %c0_90] : memref<88x32xf32, #tpu.memory_space<vmem>>, vector<8x32xf32>
    tpu.vector_store %arg9[%c8, %c0_90], %178 {strides = array<i32>} : memref<88x32xf32, #tpu.memory_space<vmem>>, vector<8x32xf32>,
    %c1 = arith.constant 1 : index
    %c0_91 = arith.constant 0 : index
    %c0_92 = arith.constant 0 : index
    %180 = vector.load %arg8[%c1, %c0_91, %c0_92] : memref<11x8x32xf32, #tpu.memory_space<vmem>>, vector<1x8x32xf32>
    %181 = vector.shape_cast %180 : vector<1x8x32xf32> to vector<8x32xf32>
    %c2 = arith.constant 2 : index
    %c0_93 = arith.constant 0 : index
    %c0_94 = arith.constant 0 : index
    %182 = vector.load %arg8[%c2, %c0_93, %c0_94] : memref<11x8x32xf32, #tpu.memory_space<vmem>>, vector<1x8x32xf32>
    %183 = vector.shape_cast %182 : vector<1x8x32xf32> to vector<8x32xf32>
    %cst_95 = arith.constant 0.888888895 : f32
    %184 = vector.broadcast %cst_95 : f32 to vector<8x32xf32>
    %185 = arith.mulf %184, %181 : vector<8x32xf32>
    %cst_96 = arith.constant 0.111111112 : f32
    %186 = vector.broadcast %cst_96 : f32 to vector<8x32xf32>
    %187 = arith.mulf %186, %183 : vector<8x32xf32>
    %188 = arith.addf %185, %187 : vector<8x32xf32>
    %c16 = arith.constant 16 : index
    %c0_97 = arith.constant 0 : index
    %189 = vector.load %arg9[%c16, %c0_97] : memref<88x32xf32, #tpu.memory_space<vmem>>, vector<8x32xf32>
    tpu.vector_store %arg9[%c16, %c0_97], %188 {strides = array<i32>} : memref<88x32xf32, #tpu.memory_space<vmem>>, vector<8x32xf32>,
    %c2_98 = arith.constant 2 : index
    %c0_99 = arith.constant 0 : index
    %c0_100 = arith.constant 0 : index
    %190 = vector.load %arg8[%c2_98, %c0_99, %c0_100] : memref<11x8x32xf32, #tpu.memory_space<vmem>>, vector<1x8x32xf32>
    %191 = vector.shape_cast %190 : vector<1x8x32xf32> to vector<8x32xf32>
    %c3 = arith.constant 3 : index
    %c0_101 = arith.constant 0 : index
    %c0_102 = arith.constant 0 : index
    %192 = vector.load %arg8[%c3, %c0_101, %c0_102] : memref<11x8x32xf32, #tpu.memory_space<vmem>>, vector<1x8x32xf32>
    %193 = vector.shape_cast %192 : vector<1x8x32xf32> to vector<8x32xf32>
    %cst_103 = arith.constant 0.777777791 : f32
    %194 = vector.broadcast %cst_103 : f32 to vector<8x32xf32>
    %195 = arith.mulf %194, %191 : vector<8x32xf32>
    %cst_104 = arith.constant 0.222222224 : f32
    %196 = vector.broadcast %cst_104 : f32 to vector<8x32xf32>
    %197 = arith.mulf %196, %193 : vector<8x32xf32>
    %198 = arith.addf %195, %197 : vector<8x32xf32>
    %c24 = arith.constant 24 : index
    %c0_105 = arith.constant 0 : index
    %199 = vector.load %arg9[%c24, %c0_105] : memref<88x32xf32, #tpu.memory_space<vmem>>, vector<8x32xf32>
    tpu.vector_store %arg9[%c24, %c0_105], %198 {strides = array<i32>} : memref<88x32xf32, #tpu.memory_space<vmem>>, vector<8x32xf32>,
    %c3_106 = arith.constant 3 : index
    %c0_107 = arith.constant 0 : index
    %c0_108 = arith.constant 0 : index
    %200 = vector.load %arg8[%c3_106, %c0_107, %c0_108] : memref<11x8x32xf32, #tpu.memory_space<vmem>>, vector<1x8x32xf32>
    %201 = vector.shape_cast %200 : vector<1x8x32xf32> to vector<8x32xf32>
    %c4 = arith.constant 4 : index
    %c0_109 = arith.constant 0 : index
    %c0_110 = arith.constant 0 : index
    %202 = vector.load %arg8[%c4, %c0_109, %c0_110] : memref<11x8x32xf32, #tpu.memory_space<vmem>>, vector<1x8x32xf32>
    %203 = vector.shape_cast %202 : vector<1x8x32xf32> to vector<8x32xf32>
    %cst_111 = arith.constant 0.666666686 : f32
    %204 = vector.broadcast %cst_111 : f32 to vector<8x32xf32>
    %205 = arith.mulf %204, %201 : vector<8x32xf32>
    %cst_112 = arith.constant 0.333333343 : f32
    %206 = vector.broadcast %cst_112 : f32 to vector<8x32xf32>
    %207 = arith.mulf %206, %203 : vector<8x32xf32>
    %208 = arith.addf %205, %207 : vector<8x32xf32>
    %c32 = arith.constant 32 : index
    %c0_113 = arith.constant 0 : index
    %209 = vector.load %arg9[%c32, %c0_113] : memref<88x32xf32, #tpu.memory_space<vmem>>, vector<8x32xf32>
    tpu.vector_store %arg9[%c32, %c0_113], %208 {strides = array<i32>} : memref<88x32xf32, #tpu.memory_space<vmem>>, vector<8x32xf32>,
    %c4_114 = arith.constant 4 : index
    %c0_115 = arith.constant 0 : index
    %c0_116 = arith.constant 0 : index
    %210 = vector.load %arg8[%c4_114, %c0_115, %c0_116] : memref<11x8x32xf32, #tpu.memory_space<vmem>>, vector<1x8x32xf32>
    %211 = vector.shape_cast %210 : vector<1x8x32xf32> to vector<8x32xf32>
    %c5 = arith.constant 5 : index
    %c0_117 = arith.constant 0 : index
    %c0_118 = arith.constant 0 : index
    %212 = vector.load %arg8[%c5, %c0_117, %c0_118] : memref<11x8x32xf32, #tpu.memory_space<vmem>>, vector<1x8x32xf32>
    %213 = vector.shape_cast %212 : vector<1x8x32xf32> to vector<8x32xf32>
    %cst_119 = arith.constant 0.555555582 : f32
    %214 = vector.broadcast %cst_119 : f32 to vector<8x32xf32>
    %215 = arith.mulf %214, %211 : vector<8x32xf32>
    %cst_120 = arith.constant 0.444444448 : f32
    %216 = vector.broadcast %cst_120 : f32 to vector<8x32xf32>
    %217 = arith.mulf %216, %213 : vector<8x32xf32>
    %218 = arith.addf %215, %217 : vector<8x32xf32>
    %c40 = arith.constant 40 : index
    %c0_121 = arith.constant 0 : index
    %219 = vector.load %arg9[%c40, %c0_121] : memref<88x32xf32, #tpu.memory_space<vmem>>, vector<8x32xf32>
    tpu.vector_store %arg9[%c40, %c0_121], %218 {strides = array<i32>} : memref<88x32xf32, #tpu.memory_space<vmem>>, vector<8x32xf32>,
    %c5_122 = arith.constant 5 : index
    %c0_123 = arith.constant 0 : index
    %c0_124 = arith.constant 0 : index
    %220 = vector.load %arg8[%c5_122, %c0_123, %c0_124] : memref<11x8x32xf32, #tpu.memory_space<vmem>>, vector<1x8x32xf32>
    %221 = vector.shape_cast %220 : vector<1x8x32xf32> to vector<8x32xf32>
    %c6 = arith.constant 6 : index
    %c0_125 = arith.constant 0 : index
    %c0_126 = arith.constant 0 : index
    %222 = vector.load %arg8[%c6, %c0_125, %c0_126] : memref<11x8x32xf32, #tpu.memory_space<vmem>>, vector<1x8x32xf32>
    %223 = vector.shape_cast %222 : vector<1x8x32xf32> to vector<8x32xf32>
    %cst_127 = arith.constant 0.444444448 : f32
    %224 = vector.broadcast %cst_127 : f32 to vector<8x32xf32>
    %225 = arith.mulf %224, %221 : vector<8x32xf32>
    %cst_128 = arith.constant 0.555555582 : f32
    %226 = vector.broadcast %cst_128 : f32 to vector<8x32xf32>
    %227 = arith.mulf %226, %223 : vector<8x32xf32>
    %228 = arith.addf %225, %227 : vector<8x32xf32>
    %c48 = arith.constant 48 : index
    %c0_129 = arith.constant 0 : index
    %229 = vector.load %arg9[%c48, %c0_129] : memref<88x32xf32, #tpu.memory_space<vmem>>, vector<8x32xf32>
    tpu.vector_store %arg9[%c48, %c0_129], %228 {strides = array<i32>} : memref<88x32xf32, #tpu.memory_space<vmem>>, vector<8x32xf32>,
    %c6_130 = arith.constant 6 : index
    %c0_131 = arith.constant 0 : index
    %c0_132 = arith.constant 0 : index
    %230 = vector.load %arg8[%c6_130, %c0_131, %c0_132] : memref<11x8x32xf32, #tpu.memory_space<vmem>>, vector<1x8x32xf32>
    %231 = vector.shape_cast %230 : vector<1x8x32xf32> to vector<8x32xf32>
    %c7 = arith.constant 7 : index
    %c0_133 = arith.constant 0 : index
    %c0_134 = arith.constant 0 : index
    %232 = vector.load %arg8[%c7, %c0_133, %c0_134] : memref<11x8x32xf32, #tpu.memory_space<vmem>>, vector<1x8x32xf32>
    %233 = vector.shape_cast %232 : vector<1x8x32xf32> to vector<8x32xf32>
    %cst_135 = arith.constant 0.333333343 : f32
    %234 = vector.broadcast %cst_135 : f32 to vector<8x32xf32>
    %235 = arith.mulf %234, %231 : vector<8x32xf32>
    %cst_136 = arith.constant 0.666666686 : f32
    %236 = vector.broadcast %cst_136 : f32 to vector<8x32xf32>
    %237 = arith.mulf %236, %233 : vector<8x32xf32>
    %238 = arith.addf %235, %237 : vector<8x32xf32>
    %c56 = arith.constant 56 : index
    %c0_137 = arith.constant 0 : index
    %239 = vector.load %arg9[%c56, %c0_137] : memref<88x32xf32, #tpu.memory_space<vmem>>, vector<8x32xf32>
    tpu.vector_store %arg9[%c56, %c0_137], %238 {strides = array<i32>} : memref<88x32xf32, #tpu.memory_space<vmem>>, vector<8x32xf32>,
    %c7_138 = arith.constant 7 : index
    %c0_139 = arith.constant 0 : index
    %c0_140 = arith.constant 0 : index
    %240 = vector.load %arg8[%c7_138, %c0_139, %c0_140] : memref<11x8x32xf32, #tpu.memory_space<vmem>>, vector<1x8x32xf32>
    %241 = vector.shape_cast %240 : vector<1x8x32xf32> to vector<8x32xf32>
    %c8_141 = arith.constant 8 : index
    %c0_142 = arith.constant 0 : index
    %c0_143 = arith.constant 0 : index
    %242 = vector.load %arg8[%c8_141, %c0_142, %c0_143] : memref<11x8x32xf32, #tpu.memory_space<vmem>>, vector<1x8x32xf32>
    %243 = vector.shape_cast %242 : vector<1x8x32xf32> to vector<8x32xf32>
    %cst_144 = arith.constant 0.222222224 : f32
    %244 = vector.broadcast %cst_144 : f32 to vector<8x32xf32>
    %245 = arith.mulf %244, %241 : vector<8x32xf32>
    %cst_145 = arith.constant 0.777777791 : f32
    %246 = vector.broadcast %cst_145 : f32 to vector<8x32xf32>
    %247 = arith.mulf %246, %243 : vector<8x32xf32>
    %248 = arith.addf %245, %247 : vector<8x32xf32>
    %c64 = arith.constant 64 : index
    %c0_146 = arith.constant 0 : index
    %249 = vector.load %arg9[%c64, %c0_146] : memref<88x32xf32, #tpu.memory_space<vmem>>, vector<8x32xf32>
    tpu.vector_store %arg9[%c64, %c0_146], %248 {strides = array<i32>} : memref<88x32xf32, #tpu.memory_space<vmem>>, vector<8x32xf32>,
    %c8_147 = arith.constant 8 : index
    %c0_148 = arith.constant 0 : index
    %c0_149 = arith.constant 0 : index
    %250 = vector.load %arg8[%c8_147, %c0_148, %c0_149] : memref<11x8x32xf32, #tpu.memory_space<vmem>>, vector<1x8x32xf32>
    %251 = vector.shape_cast %250 : vector<1x8x32xf32> to vector<8x32xf32>
    %c9 = arith.constant 9 : index
    %c0_150 = arith.constant 0 : index
    %c0_151 = arith.constant 0 : index
    %252 = vector.load %arg8[%c9, %c0_150, %c0_151] : memref<11x8x32xf32, #tpu.memory_space<vmem>>, vector<1x8x32xf32>
    %253 = vector.shape_cast %252 : vector<1x8x32xf32> to vector<8x32xf32>
    %cst_152 = arith.constant 0.111111112 : f32
    %254 = vector.broadcast %cst_152 : f32 to vector<8x32xf32>
    %255 = arith.mulf %254, %251 : vector<8x32xf32>
    %cst_153 = arith.constant 0.888888895 : f32
    %256 = vector.broadcast %cst_153 : f32 to vector<8x32xf32>
    %257 = arith.mulf %256, %253 : vector<8x32xf32>
    %258 = arith.addf %255, %257 : vector<8x32xf32>
    %c72 = arith.constant 72 : index
    %c0_154 = arith.constant 0 : index
    %259 = vector.load %arg9[%c72, %c0_154] : memref<88x32xf32, #tpu.memory_space<vmem>>, vector<8x32xf32>
    tpu.vector_store %arg9[%c72, %c0_154], %258 {strides = array<i32>} : memref<88x32xf32, #tpu.memory_space<vmem>>, vector<8x32xf32>,
    %c10_155 = arith.constant 10 : index
    %c0_156 = arith.constant 0 : index
    %c0_157 = arith.constant 0 : index
    %260 = vector.load %arg8[%c10_155, %c0_156, %c0_157] : memref<11x8x32xf32, #tpu.memory_space<vmem>>, vector<1x8x32xf32>
    %261 = vector.shape_cast %260 : vector<1x8x32xf32> to vector<8x32xf32>
    %c80 = arith.constant 80 : index
    %c0_158 = arith.constant 0 : index
    %262 = vector.load %arg9[%c80, %c0_158] : memref<88x32xf32, #tpu.memory_space<vmem>>, vector<8x32xf32>
    tpu.vector_store %arg9[%c80, %c0_158], %261 {strides = array<i32>} : memref<88x32xf32, #tpu.memory_space<vmem>>, vector<8x32xf32>,
    %c0_159 = arith.constant 0 : index
    %c0_160 = arith.constant 0 : index
    %263 = vector.load %arg9[%c0_159, %c0_160] : memref<88x32xf32, #tpu.memory_space<vmem>>, vector<88x32xf32>
    %264 = arith.truncf %263 : vector<88x32xf32> to vector<88x32xbf16>
    %c0_161 = arith.constant 0 : index
    %c0_162 = arith.constant 0 : index
    %265 = vector.load %arg4[%c0_161, %c0_162] : memref<32x128xbf16, #tpu.memory_space<vmem>>, vector<32x128xbf16>
    %cst_163 = arith.constant dense<0.000000e+00> : vector<88x128xf32>
    %266 = tpu.matmul %264, %265, %cst_163 {dimension_numbers = #tpu.dot_dimension_numbers<[1], [0], [0], [1], [0, 0, 1, 1], [], []>} : vector<88x32xbf16>, vector<32x128xbf16>, vector<88x128xf32> -> vector<88x128xf32>
    %c0_164 = arith.constant 0 : index
    %c0_165 = arith.constant 0 : index
    %267 = vector.load %arg5[%c0_164, %c0_165] : memref<1x128xf32, #tpu.memory_space<vmem>>, vector<1x128xf32>
    %268 = vector.broadcast %267 : vector<1x128xf32> to vector<88x128xf32>
    %269 = arith.addf %266, %268 : vector<88x128xf32>
    %270 = vector.extract_strided_slice %269 {offsets = [0, 0], sizes = [8, 128], strides = [1, 1]} : vector<88x128xf32> to vector<8x128xf32>
    %c0_166 = arith.constant 0 : index
    %c0_167 = arith.constant 0 : index
    %271 = vector.load %arg6[%c0_166, %c0_167] : memref<8x128xf32, #tpu.memory_space<vmem>>, vector<8x128xf32>
    tpu.vector_store %arg6[%c0_166, %c0_167], %270 {strides = array<i32>} : memref<8x128xf32, #tpu.memory_space<vmem>>, vector<8x128xf32>,
    %272 = vector.extract_strided_slice %269 {offsets = [8, 0], sizes = [8, 128], strides = [1, 1]} : vector<88x128xf32> to vector<8x128xf32>
    %c0_168 = arith.constant 0 : index
    %c0_169 = arith.constant 0 : index
    %c0_170 = arith.constant 0 : index
    %273 = vector.load %arg7[%c0_168, %c0_169, %c0_170] : memref<10x8x128xf32, #tpu.memory_space<vmem>>, vector<1x8x128xf32>
    %274 = vector.shape_cast %273 : vector<1x8x128xf32> to vector<8x128xf32>
    %275 = vector.shape_cast %272 : vector<8x128xf32> to vector<1x8x128xf32>
    tpu.vector_store %arg7[%c0_168, %c0_169, %c0_170], %275 {strides = array<i32>} : memref<10x8x128xf32, #tpu.memory_space<vmem>>, vector<1x8x128xf32>,
    %276 = vector.extract_strided_slice %269 {offsets = [16, 0], sizes = [8, 128], strides = [1, 1]} : vector<88x128xf32> to vector<8x128xf32>
    %c1_171 = arith.constant 1 : index
    %c0_172 = arith.constant 0 : index
    %c0_173 = arith.constant 0 : index
    %277 = vector.load %arg7[%c1_171, %c0_172, %c0_173] : memref<10x8x128xf32, #tpu.memory_space<vmem>>, vector<1x8x128xf32>
    %278 = vector.shape_cast %277 : vector<1x8x128xf32> to vector<8x128xf32>
    %279 = vector.shape_cast %276 : vector<8x128xf32> to vector<1x8x128xf32>
    tpu.vector_store %arg7[%c1_171, %c0_172, %c0_173], %279 {strides = array<i32>} : memref<10x8x128xf32, #tpu.memory_space<vmem>>, vector<1x8x128xf32>,
    %280 = vector.extract_strided_slice %269 {offsets = [24, 0], sizes = [8, 128], strides = [1, 1]} : vector<88x128xf32> to vector<8x128xf32>
    %c2_174 = arith.constant 2 : index
    %c0_175 = arith.constant 0 : index
    %c0_176 = arith.constant 0 : index
    %281 = vector.load %arg7[%c2_174, %c0_175, %c0_176] : memref<10x8x128xf32, #tpu.memory_space<vmem>>, vector<1x8x128xf32>
    %282 = vector.shape_cast %281 : vector<1x8x128xf32> to vector<8x128xf32>
    %283 = vector.shape_cast %280 : vector<8x128xf32> to vector<1x8x128xf32>
    tpu.vector_store %arg7[%c2_174, %c0_175, %c0_176], %283 {strides = array<i32>} : memref<10x8x128xf32, #tpu.memory_space<vmem>>, vector<1x8x128xf32>,
    %284 = vector.extract_strided_slice %269 {offsets = [32, 0], sizes = [8, 128], strides = [1, 1]} : vector<88x128xf32> to vector<8x128xf32>
    %c3_177 = arith.constant 3 : index
    %c0_178 = arith.constant 0 : index
    %c0_179 = arith.constant 0 : index
    %285 = vector.load %arg7[%c3_177, %c0_178, %c0_179] : memref<10x8x128xf32, #tpu.memory_space<vmem>>, vector<1x8x128xf32>
    %286 = vector.shape_cast %285 : vector<1x8x128xf32> to vector<8x128xf32>
    %287 = vector.shape_cast %284 : vector<8x128xf32> to vector<1x8x128xf32>
    tpu.vector_store %arg7[%c3_177, %c0_178, %c0_179], %287 {strides = array<i32>} : memref<10x8x128xf32, #tpu.memory_space<vmem>>, vector<1x8x128xf32>,
    %288 = vector.extract_strided_slice %269 {offsets = [40, 0], sizes = [8, 128], strides = [1, 1]} : vector<88x128xf32> to vector<8x128xf32>
    %c4_180 = arith.constant 4 : index
    %c0_181 = arith.constant 0 : index
    %c0_182 = arith.constant 0 : index
    %289 = vector.load %arg7[%c4_180, %c0_181, %c0_182] : memref<10x8x128xf32, #tpu.memory_space<vmem>>, vector<1x8x128xf32>
    %290 = vector.shape_cast %289 : vector<1x8x128xf32> to vector<8x128xf32>
    %291 = vector.shape_cast %288 : vector<8x128xf32> to vector<1x8x128xf32>
    tpu.vector_store %arg7[%c4_180, %c0_181, %c0_182], %291 {strides = array<i32>} : memref<10x8x128xf32, #tpu.memory_space<vmem>>, vector<1x8x128xf32>,
    %292 = vector.extract_strided_slice %269 {offsets = [48, 0], sizes = [8, 128], strides = [1, 1]} : vector<88x128xf32> to vector<8x128xf32>
    %c5_183 = arith.constant 5 : index
    %c0_184 = arith.constant 0 : index
    %c0_185 = arith.constant 0 : index
    %293 = vector.load %arg7[%c5_183, %c0_184, %c0_185] : memref<10x8x128xf32, #tpu.memory_space<vmem>>, vector<1x8x128xf32>
    %294 = vector.shape_cast %293 : vector<1x8x128xf32> to vector<8x128xf32>
    %295 = vector.shape_cast %292 : vector<8x128xf32> to vector<1x8x128xf32>
    tpu.vector_store %arg7[%c5_183, %c0_184, %c0_185], %295 {strides = array<i32>} : memref<10x8x128xf32, #tpu.memory_space<vmem>>, vector<1x8x128xf32>,
    %296 = vector.extract_strided_slice %269 {offsets = [56, 0], sizes = [8, 128], strides = [1, 1]} : vector<88x128xf32> to vector<8x128xf32>
    %c6_186 = arith.constant 6 : index
    %c0_187 = arith.constant 0 : index
    %c0_188 = arith.constant 0 : index
    %297 = vector.load %arg7[%c6_186, %c0_187, %c0_188] : memref<10x8x128xf32, #tpu.memory_space<vmem>>, vector<1x8x128xf32>
    %298 = vector.shape_cast %297 : vector<1x8x128xf32> to vector<8x128xf32>
    %299 = vector.shape_cast %296 : vector<8x128xf32> to vector<1x8x128xf32>
    tpu.vector_store %arg7[%c6_186, %c0_187, %c0_188], %299 {strides = array<i32>} : memref<10x8x128xf32, #tpu.memory_space<vmem>>, vector<1x8x128xf32>,
    %300 = vector.extract_strided_slice %269 {offsets = [64, 0], sizes = [8, 128], strides = [1, 1]} : vector<88x128xf32> to vector<8x128xf32>
    %c7_189 = arith.constant 7 : index
    %c0_190 = arith.constant 0 : index
    %c0_191 = arith.constant 0 : index
    %301 = vector.load %arg7[%c7_189, %c0_190, %c0_191] : memref<10x8x128xf32, #tpu.memory_space<vmem>>, vector<1x8x128xf32>
    %302 = vector.shape_cast %301 : vector<1x8x128xf32> to vector<8x128xf32>
    %303 = vector.shape_cast %300 : vector<8x128xf32> to vector<1x8x128xf32>
    tpu.vector_store %arg7[%c7_189, %c0_190, %c0_191], %303 {strides = array<i32>} : memref<10x8x128xf32, #tpu.memory_space<vmem>>, vector<1x8x128xf32>,
    %304 = vector.extract_strided_slice %269 {offsets = [72, 0], sizes = [8, 128], strides = [1, 1]} : vector<88x128xf32> to vector<8x128xf32>
    %c8_192 = arith.constant 8 : index
    %c0_193 = arith.constant 0 : index
    %c0_194 = arith.constant 0 : index
    %305 = vector.load %arg7[%c8_192, %c0_193, %c0_194] : memref<10x8x128xf32, #tpu.memory_space<vmem>>, vector<1x8x128xf32>
    %306 = vector.shape_cast %305 : vector<1x8x128xf32> to vector<8x128xf32>
    %307 = vector.shape_cast %304 : vector<8x128xf32> to vector<1x8x128xf32>
    tpu.vector_store %arg7[%c8_192, %c0_193, %c0_194], %307 {strides = array<i32>} : memref<10x8x128xf32, #tpu.memory_space<vmem>>, vector<1x8x128xf32>,
    %308 = vector.extract_strided_slice %269 {offsets = [80, 0], sizes = [8, 128], strides = [1, 1]} : vector<88x128xf32> to vector<8x128xf32>
    %c9_195 = arith.constant 9 : index
    %c0_196 = arith.constant 0 : index
    %c0_197 = arith.constant 0 : index
    %309 = vector.load %arg7[%c9_195, %c0_196, %c0_197] : memref<10x8x128xf32, #tpu.memory_space<vmem>>, vector<1x8x128xf32>
    %310 = vector.shape_cast %309 : vector<1x8x128xf32> to vector<8x128xf32>
    %311 = vector.shape_cast %308 : vector<8x128xf32> to vector<1x8x128xf32>
    tpu.vector_store %arg7[%c9_195, %c0_196, %c0_197], %311 {strides = array<i32>} : memref<10x8x128xf32, #tpu.memory_space<vmem>>, vector<1x8x128xf32>,
    return
  }
  func.func @transform_0(%arg0: i32) -> (i32, i32) {
    %c0_i32 = arith.constant 0 : i32
    %c0_i32_0 = arith.constant 0 : i32
    return %arg0, %c0_i32 : i32, i32
  }
  func.func @transform_1(%arg0: i32) -> (i32, i32, i32) {
    %c0_i32 = arith.constant 0 : i32
    %c0_i32_0 = arith.constant 0 : i32
    %c0_i32_1 = arith.constant 0 : i32
    %c0_i32_2 = arith.constant 0 : i32
    return %c0_i32, %c0_i32_0, %c0_i32_1 : i32, i32, i32
  }
  func.func @transform_2(%arg0: i32) -> (i32, i32, i32) {
    %c0_i32 = arith.constant 0 : i32
    %c0_i32_0 = arith.constant 0 : i32
    %c0_i32_1 = arith.constant 0 : i32
    %c0_i32_2 = arith.constant 0 : i32
    return %c0_i32, %c0_i32_0, %c0_i32_1 : i32, i32, i32
  }
  func.func @transform_3(%arg0: i32) -> (i32, i32) {
    %c0_i32 = arith.constant 0 : i32
    %c0_i32_0 = arith.constant 0 : i32
    %c0_i32_1 = arith.constant 0 : i32
    return %c0_i32, %c0_i32_0 : i32, i32
  }
  func.func @transform_4(%arg0: i32) -> (i32, i32) {
    %c0_i32 = arith.constant 0 : i32
    %c0_i32_0 = arith.constant 0 : i32
    %c0_i32_1 = arith.constant 0 : i32
    return %c0_i32, %c0_i32_0 : i32, i32
  }
  func.func @transform_5(%arg0: i32) -> (i32, i32) {
    %c0_i32 = arith.constant 0 : i32
    %c0_i32_0 = arith.constant 0 : i32
    return %arg0, %c0_i32 : i32, i32
  }
  func.func @transform_6(%arg0: i32) -> (i32, i32, i32) {
    %c0_i32 = arith.constant 0 : i32
    %c0_i32_0 = arith.constant 0 : i32
    %c0_i32_1 = arith.constant 0 : i32
    return %c0_i32, %arg0, %c0_i32_0 : i32, i32, i32
  }
}

</mosaic_0001>

<bundles_post_ra>
// kernel: neural_ode_forward.1
= control target key start
LH: loop header
LB: loop body
LE: loop exit
PB: predicated region body
PF: predicated region fallthrough
CT: control target
= control target key end

     0   :  { %12 = vsyncpa [#allocation5], 0  ;;  %s1581_s0 = inlined_call_operand.hbm [shape: f32[8,32], index: 0, kind: input, shape index: {}]   ;;  %s1582_s1 = inlined_call_operand.hbm [shape: bf16[10,32,32], index: 1, kind: input, shape index: {}]   ;;  %s1583_s2 = inlined_call_operand.hbm [shape: f32[10,1,32], index: 2, kind: input, shape index: {}]   ;;  %s1584_s3 = inlined_call_operand.hbm [shape: bf16[32,128], index: 3, kind: input, shape index: {}]   ;;  %s1585_s4 = inlined_call_operand.vmem [shape: f32[1,128], index: 4, kind: input, shape index: {}]   ;;  %s1586_s5 = inlined_call_operand.vmem [shape: f32[8,128], index: 5, kind: output, shape index: {0}]   ;;  %s1587_s6 = inlined_call_operand.vmem [shape: f32[10,8,128], index: 6, kind: output, shape index: {1}]  }
   0x1   :  { %13 = vsyncpa [#allocation7], 0 }
   0x2   :  { %14 = vsyncpa [#allocation10], 0  ;;  %s1368_s21 = smov [#allocation6]   ;;  %s1274_s25 = scalar_lea.hbm %s1582_s1, 2560 }
   0x3   :  { %s30_s22 = sshll.u32 %s1368_s21, 4  ;;  %p1275_p0 = scmp.ne.s32.totalorder %s1582_s1, %s1274_s25  ;;  %s31_s22 = int_to_ptr.vmem [resolvable:$true] %s30_s22 }
   0x4   :  { %p1278_p1 = scmp.lt.u32.totalorder %s1274_s25, %s1582_s1 }
   0x6   :  { %p1280_p2 = pnand %p1278_p1, %p1275_p0 }
   0x8   :  { %1283 = shalt.err (!%p1280_p2)
}
   0x9   :  { %s1284_s30 = scalar_lea.vmem %s31_s22, 2560  ;;  %p1289_p4 = scmp.lt.s32.totalorder %s31_s22, %s31_s22 }
   0xa   :  { %p1285_p3 = scmp.ne.s32.totalorder %s31_s22, %s1284_s30  ;;  %p1290_p5 = scmp.lt.s32.totalorder %s1284_s30, %s1284_s30 }
   0xc   :  { %p1291_p6 = por %p1290_p5, %p1289_p4 }
   0xe   :  { %p1292_p7 = pnand %p1291_p6, %p1285_p3 }
  0x10   :  { %1295 = shalt.err (!%p1292_p7)
}
  0x11   :  { %s1369_s7 = smov 64   ;;  %s1370_s8 = smov 4  }
  0x12   :  { %36 = dma.hbm_to_vmem [thread:$0]  %s1582_s1, 2560, %s31_s22, [#allocation7], %s1369_s7, %s1369_s7, %s1370_s8  }
  0x13   :  { %s1371_s11 = smov [#allocation4]   ;;  %s1372_s13 = smov [#allocation8]  }
  0x14   :  { %s21_s12 = sshll.u32 %s1371_s11, 4  ;;  %s42_s14 = sshll.u32 %s1372_s13, 4  ;;  %s22_s12 = int_to_ptr.vmem [resolvable:$true] %s21_s12  ;;  %s43_s14 = int_to_ptr.vmem [resolvable:$true] %s42_s14 }
  0x15   :  { %s1296_s17 = scalar_lea.hbm %s1581_s0, 128 }
  0x16   :  { %p1297_p8 = scmp.ne.s32.totalorder %s1581_s0, %s1296_s17  ;;  %p1300_p9 = scmp.lt.u32.totalorder %s1296_s17, %s1581_s0 }
  0x18   :  { %p1302_p10 = pnand %p1300_p9, %p1297_p8 }
  0x1a   :  { %1305 = shalt.err (!%p1302_p10)
}
  0x1b   :  { %s1306_s1 = scalar_lea.vmem %s22_s12, 128  ;;  %p1311_p12 = scmp.lt.s32.totalorder %s22_s12, %s22_s12 }
  0x1c   :  { %p1307_p11 = scmp.ne.s32.totalorder %s22_s12, %s1306_s1  ;;  %p1312_p13 = scmp.lt.s32.totalorder %s1306_s1, %s1306_s1 }
  0x1e   :  { %p1313_p0 = por %p1312_p13, %p1311_p12 }
  0x20   :  { %p1314_p1 = pnand %p1313_p0, %p1307_p11 }
  0x22   :  { %1317 = shalt.err (!%p1314_p1)
}
  0x23   :  { %24 = dma.hbm_to_vmem [thread:$0]  %s1581_s0, 128, %s22_s12, [#allocation5]  }
  0x24   :  { %s1318_s26 = scalar_lea.hbm %s1583_s2, 160 }
  0x25   :  { %p1319_p2 = scmp.ne.s32.totalorder %s1583_s2, %s1318_s26  ;;  %p1322_p3 = scmp.lt.u32.totalorder %s1318_s26, %s1583_s2 }
  0x27   :  { %p1324_p4 = pnand %p1322_p3, %p1319_p2 }
  0x29   :  { %1327 = shalt.err (!%p1324_p4)
}
  0x2a   :  { %s1328_s9 = scalar_lea.vmem %s43_s14, 160  ;;  %p1333_p6 = scmp.lt.s32.totalorder %s43_s14, %s43_s14 }
  0x2b   :  { %p1329_p5 = scmp.ne.s32.totalorder %s43_s14, %s1328_s9  ;;  %p1334_p7 = scmp.lt.s32.totalorder %s1328_s9, %s1328_s9 }
  0x2d   :  { %p1335_p8 = por %p1334_p7, %p1333_p6 }
  0x2f   :  { %p1336_p9 = pnand %p1335_p8, %p1329_p5 }
  0x31   :  { %1339 = shalt.err (!%p1336_p9)
}
  0x32   :  { %s1373_s0 = smov 16   ;;  %s1374_s10 = smov 1  }
  0x33   :  { %48 = dma.hbm_to_vmem [thread:$0]  %s1583_s2, 160, %s43_s14, [#allocation7], %s1373_s0, %s1373_s0, %s1374_s10  }
  0x34   :  { %s1375_s13 = smov [#allocation9]   ;;  %s1340_s18 = scalar_lea.hbm %s1584_s3, 256 }
  0x35   :  { %s54_s15 = sshll.u32 %s1375_s13, 4  ;;  %p1341_p10 = scmp.ne.s32.totalorder %s1584_s3, %s1340_s18  ;;  %s55_s15 = int_to_ptr.vmem [resolvable:$true] %s54_s15 }
  0x36   :  { %p1344_p11 = scmp.lt.u32.totalorder %s1340_s18, %s1584_s3 }
  0x38   :  { %p1346_p12 = pnand %p1344_p11, %p1341_p10 }
  0x3a   :  { %1349 = shalt.err (!%p1346_p12)
}
  0x3b   :  { %s1350_s22 = scalar_lea.vmem %s55_s15, 256  ;;  %p1355_p0 = scmp.lt.s32.totalorder %s55_s15, %s55_s15 }
  0x3c   :  { %p1351_p13 = scmp.ne.s32.totalorder %s55_s15, %s1350_s22  ;;  %p1356_p1 = scmp.lt.s32.totalorder %s1350_s22, %s1350_s22 }
  0x3e   :  { %p1357_p2 = por %p1356_p1, %p1355_p0 }
  0x40   :  { %p1358_p3 = pnand %p1357_p2, %p1351_p13 }
  0x42   :  { %1361 = shalt.err (!%p1358_p3)
}
  0x43   :  { %60 = dma.hbm_to_vmem [thread:$0]  %s1584_s3, 256, %s55_s15, [#allocation10], %s1369_s7, %s1369_s7, %s1370_s8  }
  0x44   :  { %1362 = dma.done.wait [#allocation5], 128  }
  0x45   :  { %1363 = vsyncadd [#allocation5], 4294967168 }
  0x46   :  { %1364 = dma.done.wait [#allocation7], 2720  }
  0x47   :  { %1365 = vsyncadd [#allocation7], 4294964576 }
  0x48   :  { %1366 = dma.done.wait [#allocation10], 256  }
  0x49   :  { %1367 = vsyncadd [#allocation10], 4294967040  ;;  %v1376_v0 = vmov 0.0   ;;  %vm1377_vm0 = vmmov 0   ;;  %v1232_v1 = vld [vmem:[#allocation6] sm:$0xff]   ;;  %v1233_v2 = vld [vmem:[#allocation6 + $0x8] sm:$0xff]  }
  0x4a   :  { %1126 = vmatprep.subr.bf16.mxu1 %v1376_v0  ;;  %1130 = vmatprep.mubr.msk.bf16.mxu1 %vm1377_vm0, %v1376_v0  ;;  %v76_v3 = vld [vmem:[#allocation4] sm:$0xff]  ;;  %vm77_vm1 = vcmask 261120   ;;  %v1234_v6 = vld [vmem:[#allocation6 + $0x10] sm:$0xff]   ;;  %v1030_v8 = vld [vmem:[#allocation8] ss:$0 sm:$0xff] }
  0x4b   :  { %1142 = vmatprep.subr.bf16.mxu0 %v1376_v0  ;;  %1146 = vmatprep.mubr.msk.bf16.mxu0 %vm1377_vm0, %v1376_v0  ;;  %78 = vst.msk [vmem:[#allocation2] sm:$0xff] %vm77_vm1, %v76_v3  ;;  %1254 = vtanh.f32 %v76_v3  ;;  %v1235_v7 = vld [vmem:[#allocation6 + $0x18] sm:$0xff]   ;;  %v1236_v17 = vld [vmem:[#allocation6 + $0x20] sm:$0xff]   ;;  %v1237_v18 = vld [vmem:[#allocation6 + $0x28] sm:$0xff]  }
  0x4c   :  { %1127 = vmatpush3.bf16.msra.mxu1 %v1232_v1  ;;  %1143 = vmatpush3.bf16.msra.mxu0 %v1236_v17  ;;  %v1034_v19 = vld [vmem:[#allocation8 + $0x1] ss:$0 sm:$0xff]  ;;  %v1238_v33 = vld [vmem:[#allocation6 + $0x30] sm:$0xff]   ;;  %v1239_v34 = vld [vmem:[#allocation6 + $0x38] sm:$0xff]  }
  0x4d   :  { %1128 = vmatprep.subr.bf16.mxu1 %v1376_v0  ;;  %1144 = vmatprep.subr.bf16.mxu0 %v1376_v0  ;;  %v1038_v35 = vld [vmem:[#allocation8 + $0x2] ss:$0 sm:$0xff]  ;;  %v1241_v49 = vld [vmem:[#allocation6 + $0x48] sm:$0xff]   ;;  %v1042_v50 = vld [vmem:[#allocation8 + $0x3] ss:$0 sm:$0xff] }
  0x4e   :  { %v1240_v48 = vld [vmem:[#allocation6 + $0x40] sm:$0xff]   ;;  %v1242_v63 = vld [vmem:[#allocation6 + $0x50] sm:$0xff]   ;;  %v1243_v1 = vld [vmem:[#allocation6 + $0x58] sm:$0xff]  }
  0x4f   :  { %v1050_v17 = vld [vmem:[#allocation8 + $0x5] ss:$0 sm:$0xff] }
  0x50   :  { %1129 = vmatpush3.bf16.msra.mxu1 %v1233_v2  ;;  %1145 = vmatpush3.bf16.msra.mxu0 %v1237_v18  ;;  %v1046_v2 = vld [vmem:[#allocation8 + $0x4] ss:$0 sm:$0xff] }
  0x51   :  { %1134 = vmatprep.subr.bf16.mxu1 %v1376_v0  ;;  %1158 = vmatprep.subr.bf16.mxu0 %v1376_v0 }
  0x55   :  { %v1255_v4 = vpop.eup %1254 }
  0x56   :  { %v80_v5 = vpack.c.bf16 %v1255_v4, %v1255_v4 }
  0x58   :  { %1131 = vmatmul.mubr.msk.bf16.vlgmr.msra.gmra.mrb[0].mxu1 %vm77_vm1, %v80_v5 }
  0x59   :  { %1138 = vmatprep.mubr.msk.bf16.mxu1 %vm1377_vm0, %v1376_v0  ;;  %1135 = vmatpush3.bf16.msra.mxu1 %v1234_v6 }
  0x5a   :  { %1136 = vmatprep.subr.bf16.mxu1 %v1376_v0 }
  0x5d   :  { %1137 = vmatpush3.bf16.msra.mxu1 %v1235_v7 }
  0x5e   :  { %1150 = vmatprep.subr.bf16.mxu1 %v1376_v0 }
 0x12b   :  { %v141_v9 = vpop.f32.mrb[0].mxu1 }
 0x12c   :  { %v142_v10 = vadd.f32 %v1030_v8, %v141_v9  ;;  %v1132_v11 = vpop.f32.mrb[1].mxu1 }
 0x12d   :  { %v144_v12 = vpop.f32.mrb[2].mxu1 }
 0x12e   :  { %v147_v13 = vadd.f32 %v142_v10, %v76_v3  ;;  %v1133_v14 = vpop.f32.mrb[3].mxu1 }
 0x130   :  { %149 = vst.msk [vmem:[#allocation2 + $0x8] sm:$0xff] %vm77_vm1, %v147_v13  ;;  %1256 = vtanh.f32 %v147_v13 }
 0x137   :  { %v811_v26 = vld [vmem:[#allocation2 + $0x8] sm:$0xff] }
 0x138   :  { %v813_v28 = vmul.f32 0.8888889, %v811_v26 }
 0x13a   :  { %v1257_v15 = vpop.eup %1256 }
 0x13b   :  { %v151_v16 = vpack.c.bf16 %v1257_v15, %v1257_v15  ;;  %v1244_v15 = vld [vmem:[#allocation6 + $0x60] sm:$0xff]  }
 0x13d   :  { %1139 = vmatmul.mubr.msk.bf16.vlgmr.msra.gmra.mrb[4].mxu1 %vm77_vm1, %v151_v16  ;;  %v1245_v16 = vld [vmem:[#allocation6 + $0x68] sm:$0xff]  }
 0x13e   :  { %1154 = vmatprep.mubr.msk.bf16.mxu1 %vm1377_vm0, %v1376_v0  ;;  %1151 = vmatpush3.bf16.msra.mxu1 %v1238_v33 }
 0x13f   :  { %1152 = vmatprep.subr.bf16.mxu1 %v1376_v0 }
 0x142   :  { %1153 = vmatpush3.bf16.msra.mxu1 %v1239_v34 }
 0x143   :  { %1166 = vmatprep.subr.bf16.mxu1 %v1376_v0 }
 0x210   :  { %v214_v20 = vpop.f32.mrb[4].mxu1 }
 0x211   :  { %v215_v21 = vadd.f32 %v1034_v19, %v214_v20  ;;  %v1140_v22 = vpop.f32.mrb[5].mxu1 }
 0x212   :  { %v217_v23 = vpop.f32.mrb[6].mxu1 }
 0x213   :  { %v220_v24 = vadd.f32 %v215_v21, %v147_v13  ;;  %v1141_v25 = vpop.f32.mrb[7].mxu1 }
 0x215   :  { %222 = vst.msk [vmem:[#allocation2 + $0x10] sm:$0xff] %vm77_vm1, %v220_v24  ;;  %1258 = vtanh.f32 %v220_v24 }
 0x21c   :  { %v812_v27 = vld [vmem:[#allocation2 + $0x10] sm:$0xff] }
 0x21d   :  { %v814_v29 = vmul.f32 0.11111111, %v812_v27  ;;  %v819_v43 = vmul.f32 0.7777778, %v812_v27 }
 0x21f   :  { %v1259_v30 = vpop.eup %1258  ;;  %v815_v31 = vadd.f32 %v814_v29, %v813_v28  ;;  %v1246_v29 = vld [vmem:[#allocation6 + $0x70] sm:$0xff]  }
 0x220   :  { %v224_v32 = vpack.c.bf16 %v1259_v30, %v1259_v30  ;;  %v1247_v30 = vld [vmem:[#allocation6 + $0x78] sm:$0xff]  }
 0x221   :  { %816 = vst.msk [vmem:[#allocation3 + $0x10] sm:$0xff] %vm77_vm1, %v815_v31  ;;  %v1054_v31 = vld [vmem:[#allocation8 + $0x6] ss:$0 sm:$0xff] }
 0x222   :  { %1147 = vmatmul.mubr.msk.bf16.vlgmr.msra.gmra.mrb[0].mxu0 %vm77_vm1, %v224_v32 }
 0x223   :  { %1162 = vmatprep.mubr.msk.bf16.mxu0 %vm1377_vm0, %v1376_v0  ;;  %1159 = vmatpush3.bf16.msra.mxu0 %v1240_v48 }
 0x224   :  { %1160 = vmatprep.subr.bf16.mxu0 %v1376_v0 }
 0x227   :  { %1161 = vmatpush3.bf16.msra.mxu0 %v1241_v49 }
 0x228   :  { %1174 = vmatprep.subr.bf16.mxu0 %v1376_v0 }
 0x2f5   :  { %v287_v36 = vpop.f32.mrb[0].mxu0 }
 0x2f6   :  { %v288_v37 = vadd.f32 %v1038_v35, %v287_v36  ;;  %v1148_v38 = vpop.f32.mrb[1].mxu0 }
 0x2f7   :  { %v290_v39 = vpop.f32.mrb[2].mxu0 }
 0x2f8   :  { %v293_v40 = vadd.f32 %v288_v37, %v220_v24  ;;  %v1149_v41 = vpop.f32.mrb[3].mxu0 }
 0x2fa   :  { %295 = vst.msk [vmem:[#allocation2 + $0x18] sm:$0xff] %vm77_vm1, %v293_v40  ;;  %1260 = vtanh.f32 %v293_v40 }
 0x301   :  { %v818_v42 = vld [vmem:[#allocation2 + $0x18] sm:$0xff] }
 0x302   :  { %v820_v44 = vmul.f32 0.22222222, %v818_v42  ;;  %v825_v58 = vmul.f32 0.6666667, %v818_v42 }
 0x304   :  { %v1261_v45 = vpop.eup %1260  ;;  %v821_v46 = vadd.f32 %v820_v44, %v819_v43  ;;  %v1248_v44 = vld [vmem:[#allocation6 + $0x80] sm:$0xff]  }
 0x305   :  { %v297_v47 = vpack.c.bf16 %v1261_v45, %v1261_v45  ;;  %v1249_v45 = vld [vmem:[#allocation6 + $0x88] sm:$0xff]  }
 0x306   :  { %822 = vst.msk [vmem:[#allocation3 + $0x18] sm:$0xff] %vm77_vm1, %v821_v46  ;;  %v1058_v46 = vld [vmem:[#allocation8 + $0x7] ss:$0 sm:$0xff] }
 0x307   :  { %1155 = vmatmul.mubr.msk.bf16.vlgmr.msra.gmra.mrb[8].mxu1 %vm77_vm1, %v297_v47 }
 0x308   :  { %1170 = vmatprep.mubr.msk.bf16.mxu1 %vm1377_vm0, %v1376_v0  ;;  %1167 = vmatpush3.bf16.msra.mxu1 %v1242_v63 }
 0x309   :  { %1168 = vmatprep.subr.bf16.mxu1 %v1376_v0 }
 0x30c   :  { %1169 = vmatpush3.bf16.msra.mxu1 %v1243_v1 }
 0x30d   :  { %1182 = vmatprep.subr.bf16.mxu1 %v1376_v0 }
 0x3da   :  { %v360_v51 = vpop.f32.mrb[8].mxu1 }
 0x3db   :  { %v361_v52 = vadd.f32 %v1042_v50, %v360_v51  ;;  %v1156_v53 = vpop.f32.mrb[9].mxu1 }
 0x3dc   :  { %v363_v54 = vpop.f32.mrb[10].mxu1 }
 0x3dd   :  { %v366_v55 = vadd.f32 %v361_v52, %v293_v40  ;;  %v1157_v56 = vpop.f32.mrb[11].mxu1 }
 0x3df   :  { %368 = vst.msk [vmem:[#allocation2 + $0x20] sm:$0xff] %vm77_vm1, %v366_v55  ;;  %1262 = vtanh.f32 %v366_v55 }
 0x3e6   :  { %v824_v57 = vld [vmem:[#allocation2 + $0x20] sm:$0xff] }
 0x3e7   :  { %v826_v59 = vmul.f32 0.33333334, %v824_v57  ;;  %v831_v10 = vmul.f32 0.5555556, %v824_v57 }
 0x3e9   :  { %v1263_v60 = vpop.eup %1262  ;;  %v827_v61 = vadd.f32 %v826_v59, %v825_v58  ;;  %v1250_v59 = vld [vmem:[#allocation6 + $0x90] sm:$0xff]  }
 0x3ea   :  { %v370_v62 = vpack.c.bf16 %v1263_v60, %v1263_v60  ;;  %v1251_v60 = vld [vmem:[#allocation6 + $0x98] sm:$0xff]  }
 0x3eb   :  { %828 = vst.msk [vmem:[#allocation3 + $0x20] sm:$0xff] %vm77_vm1, %v827_v61  ;;  %v1062_v61 = vld [vmem:[#allocation8 + $0x8] ss:$0 sm:$0xff] }
 0x3ec   :  { %1163 = vmatmul.mubr.msk.bf16.vlgmr.msra.gmra.mrb[4].mxu0 %vm77_vm1, %v370_v62 }
 0x3ed   :  { %1178 = vmatprep.mubr.msk.bf16.mxu0 %vm1377_vm0, %v1376_v0  ;;  %1175 = vmatpush3.bf16.msra.mxu0 %v1244_v15 }
 0x3ee   :  { %1176 = vmatprep.subr.bf16.mxu0 %v1376_v0 }
 0x3f1   :  { %1177 = vmatpush3.bf16.msra.mxu0 %v1245_v16 }
 0x3f2   :  { %1190 = vmatprep.subr.bf16.mxu0 %v1376_v0 }
 0x4bf   :  { %v433_v3 = vpop.f32.mrb[4].mxu0 }
 0x4c0   :  { %v434_v4 = vadd.f32 %v1046_v2, %v433_v3  ;;  %v1164_v5 = vpop.f32.mrb[5].mxu0 }
 0x4c1   :  { %v436_v6 = vpop.f32.mrb[6].mxu0 }
 0x4c2   :  { %v439_v7 = vadd.f32 %v434_v4, %v366_v55  ;;  %v1165_v8 = vpop.f32.mrb[7].mxu0 }
 0x4c4   :  { %441 = vst.msk [vmem:[#allocation2 + $0x28] sm:$0xff] %vm77_vm1, %v439_v7  ;;  %1264 = vtanh.f32 %v439_v7 }
 0x4cb   :  { %v830_v9 = vld [vmem:[#allocation2 + $0x28] sm:$0xff] }
 0x4cc   :  { %v832_v11 = vmul.f32 0.44444445, %v830_v9 }
 0x4ce   :  { %v1265_v12 = vpop.eup %1264  ;;  %v833_v13 = vadd.f32 %v832_v11, %v831_v10 }
 0x4cf   :  { %v443_v14 = vpack.c.bf16 %v1265_v12, %v1265_v12  ;;  %v1253_v12 = vld [vmem:[#allocation9 + $0x8] sm:$0xff]  }
 0x4d0   :  { %834 = vst.msk [vmem:[#allocation3 + $0x28] sm:$0xff] %vm77_vm1, %v833_v13  ;;  %v1066_v13 = vld [vmem:[#allocation8 + $0x9] ss:$0 sm:$0xff] }
 0x4d1   :  { %1171 = vmatmul.mubr.msk.bf16.vlgmr.msra.gmra.mrb[12].mxu1 %vm77_vm1, %v443_v14 }
 0x4d2   :  { %1186 = vmatprep.mubr.msk.bf16.mxu1 %vm1377_vm0, %v1376_v0  ;;  %1183 = vmatpush3.bf16.msra.mxu1 %v1246_v29 }
 0x4d3   :  { %1184 = vmatprep.subr.bf16.mxu1 %v1376_v0 }
 0x4d6   :  { %1185 = vmatpush3.bf16.msra.mxu1 %v1247_v30 }
 0x4d7   :  { %1198 = vmatprep.subr.bf16.mxu1 %v1376_v0 }
 0x5a4   :  { %v506_v18 = vpop.f32.mrb[12].mxu1 }
 0x5a5   :  { %v507_v19 = vadd.f32 %v1050_v17, %v506_v18  ;;  %v1172_v20 = vpop.f32.mrb[13].mxu1 }
 0x5a6   :  { %v509_v21 = vpop.f32.mrb[14].mxu1 }
 0x5a7   :  { %v512_v22 = vadd.f32 %v507_v19, %v439_v7  ;;  %v1173_v23 = vpop.f32.mrb[15].mxu1 }
 0x5a9   :  { %514 = vst.msk [vmem:[#allocation2 + $0x30] sm:$0xff] %vm77_vm1, %v512_v22  ;;  %1266 = vtanh.f32 %v512_v22 }
 0x5b0   :  { %v836_v24 = vld [vmem:[#allocation2 + $0x30] sm:$0xff] }
 0x5b1   :  { %v838_v25 = vmul.f32 0.5555556, %v836_v24  ;;  %v843_v39 = vmul.f32 0.33333334, %v836_v24  ;;  %v866_v24 = vld [vmem:[#allocation3 + $0x28] sm:$0xff] }
 0x5b3   :  { %v1267_v26 = vpop.eup %1266  ;;  %v839_v27 = vadd.f32 %v838_v25, %v832_v11  ;;  %v1252_v11 = vld [vmem:[#allocation9] sm:$0xff]  }
 0x5b4   :  { %v516_v28 = vpack.c.bf16 %v1267_v26, %v1267_v26  ;;  %v863_v26 = vld [vmem:[#allocation3 + $0x10] sm:$0xff] }
 0x5b5   :  { %840 = vst.msk [vmem:[#allocation3 + $0x30] sm:$0xff] %vm77_vm1, %v839_v27 }
 0x5b6   :  { %1179 = vmatmul.mubr.msk.bf16.vlgmr.msra.gmra.mrb[8].mxu0 %vm77_vm1, %v516_v28  ;;  %v865_v28 = vld [vmem:[#allocation3 + $0x20] sm:$0xff] }
 0x5b7   :  { %1194 = vmatprep.mubr.msk.bf16.mxu0 %vm1377_vm0, %v1376_v0  ;;  %1191 = vmatpush3.bf16.msra.mxu0 %v1248_v44  ;;  %v874_v29 = vpack.c.bf16 %v866_v24, %v865_v28 }
 0x5b8   :  { %1192 = vmatprep.subr.bf16.mxu0 %v1376_v0 }
 0x5bb   :  { %1193 = vmatpush3.bf16.msra.mxu0 %v1249_v45 }
 0x5bc   :  { %1206 = vmatprep.subr.bf16.mxu0 %v1252_v11 }
 0x689   :  { %v579_v32 = vpop.f32.mrb[8].mxu0 }
 0x68a   :  { %v580_v33 = vadd.f32 %v1054_v31, %v579_v32  ;;  %v1180_v34 = vpop.f32.mrb[9].mxu0  ;;  %v867_v32 = vld [vmem:[#allocation3 + $0x30] sm:$0xff] }
 0x68b   :  { %v582_v35 = vpop.f32.mrb[10].mxu0 }
 0x68c   :  { %v585_v36 = vadd.f32 %v580_v33, %v512_v22  ;;  %v1181_v37 = vpop.f32.mrb[11].mxu0  ;;  %v864_v22 = vld [vmem:[#allocation3 + $0x18] sm:$0xff] }
 0x68d   :  { %v873_v27 = vpack.c.bf16 %v864_v22, %v863_v26 }
 0x68e   :  { %587 = vst.msk [vmem:[#allocation2 + $0x38] sm:$0xff] %vm77_vm1, %v585_v36  ;;  %1268 = vtanh.f32 %v585_v36 }
 0x695   :  { %v842_v38 = vld [vmem:[#allocation2 + $0x38] sm:$0xff] }
 0x696   :  { %v844_v40 = vmul.f32 0.6666667, %v842_v38  ;;  %v849_v54 = vmul.f32 0.22222222, %v842_v38  ;;  %v1070_v38 = vld [vmem:[%s1585_s4] ss:$0 sm:$0xff] }
 0x698   :  { %v1269_v41 = vpop.eup %1268  ;;  %v845_v42 = vadd.f32 %v844_v40, %v843_v39 }
 0x699   :  { %v589_v43 = vpack.c.bf16 %v1269_v41, %v1269_v41 }
 0x69a   :  { %846 = vst.msk [vmem:[#allocation3 + $0x38] sm:$0xff] %vm77_vm1, %v845_v42 }
 0x69b   :  { %1187 = vmatmul.mubr.msk.bf16.vlgmr.msra.gmra.mrb[16].mxu1 %vm77_vm1, %v589_v43 }
 0x69c   :  { %1202 = vmatprep.mubr.msk.bf16.mxu1 %vm1377_vm0, %v1376_v0  ;;  %1199 = vmatpush3.bf16.msra.mxu1 %v1250_v59 }
 0x69d   :  { %1200 = vmatprep.subr.bf16.mxu1 %v1376_v0  ;;  %v809_v0 = vld [vmem:[#allocation2] sm:$0xff] }
 0x69e   :  { %810 = vst.msk [vmem:[#allocation3 + $0x8] sm:$0xff] %vm77_vm1, %v809_v0 }
 0x6a0   :  { %1201 = vmatpush3.bf16.msra.mxu1 %v1251_v60 }
 0x6a1   :  { %v868_v30 = vld [vmem:[#allocation3 + $0x38] sm:$0xff] }
 0x6a2   :  { %v875_v33 = vpack.c.bf16 %v868_v30, %v867_v32 }
 0x6a5   :  { %v862_v21 = vld [vmem:[#allocation3 + $0x8] sm:$0xff] }
 0x76e   :  { %v652_v47 = vpop.f32.mrb[16].mxu1 }
 0x76f   :  { %v653_v48 = vadd.f32 %v1058_v46, %v652_v47  ;;  %v1188_v49 = vpop.f32.mrb[17].mxu1 }
 0x770   :  { %v655_v50 = vpop.f32.mrb[18].mxu1 }
 0x771   :  { %v658_v51 = vadd.f32 %v653_v48, %v585_v36  ;;  %v1189_v52 = vpop.f32.mrb[19].mxu1 }
 0x773   :  { %660 = vst.msk [vmem:[#allocation2 + $0x40] sm:$0xff] %vm77_vm1, %v658_v51  ;;  %1270 = vtanh.f32 %v658_v51 }
 0x77a   :  { %v848_v53 = vld [vmem:[#allocation2 + $0x40] sm:$0xff] }
 0x77b   :  { %v850_v55 = vmul.f32 0.7777778, %v848_v53  ;;  %v855_v6 = vmul.f32 0.11111111, %v848_v53 }
 0x77d   :  { %v1271_v56 = vpop.eup %1270  ;;  %v851_v57 = vadd.f32 %v850_v55, %v849_v54 }
 0x77e   :  { %v662_v58 = vpack.c.bf16 %v1271_v56, %v1271_v56 }
 0x77f   :  { %852 = vst.msk [vmem:[#allocation3 + $0x40] sm:$0xff] %vm77_vm1, %v851_v57 }
 0x780   :  { %1195 = vmatmul.mubr.msk.bf16.vlgmr.msra.gmra.mrb[12].mxu0 %vm77_vm1, %v662_v58 }
 0x781   :  { %1207 = vmatpush3.bf16.msra.mxu0 %v1252_v11 }
 0x782   :  { %1208 = vmatprep.subr.bf16.mxu0 %v1253_v12 }
 0x785   :  { %1209 = vmatpush3.bf16.msra.mxu0 %v1253_v12 }
 0x786   :  { %v869_v34 = vld [vmem:[#allocation3 + $0x40] sm:$0xff] }
 0x853   :  { %v725_v62 = vpop.f32.mrb[12].mxu0 }
 0x854   :  { %v726_v63 = vadd.f32 %v1062_v61, %v725_v62  ;;  %v1196_v1 = vpop.f32.mrb[13].mxu0 }
 0x855   :  { %v728_v2 = vpop.f32.mrb[14].mxu0 }
 0x856   :  { %v731_v3 = vadd.f32 %v726_v63, %v658_v51  ;;  %v1197_v4 = vpop.f32.mrb[15].mxu0 }
 0x858   :  { %733 = vst.msk [vmem:[#allocation2 + $0x48] sm:$0xff] %vm77_vm1, %v731_v3  ;;  %1272 = vtanh.f32 %v731_v3 }
 0x85f   :  { %v854_v5 = vld [vmem:[#allocation2 + $0x48] sm:$0xff] }
 0x860   :  { %v856_v7 = vmul.f32 0.8888889, %v854_v5 }
 0x862   :  { %v1273_v8 = vpop.eup %1272  ;;  %v857_v9 = vadd.f32 %v856_v7, %v855_v6 }
 0x863   :  { %v735_v10 = vpack.c.bf16 %v1273_v8, %v1273_v8 }
 0x864   :  { %858 = vst.msk [vmem:[#allocation3 + $0x48] sm:$0xff] %vm77_vm1, %v857_v9 }
 0x865   :  { %1203 = vmatmul.mubr.msk.bf16.vlgmr.msra.gmra.mrb[20].mxu1 %vm77_vm1, %v735_v10 }
 0x86b   :  { %v870_v31 = vld [vmem:[#allocation3 + $0x48] sm:$0xff] }
 0x86c   :  { %v876_v35 = vpack.c.bf16 %v870_v31, %v869_v34 }
 0x938   :  { %v798_v14 = vpop.f32.mrb[20].mxu1 }
 0x939   :  { %v799_v15 = vadd.f32 %v1066_v13, %v798_v14  ;;  %v1204_v16 = vpop.f32.mrb[21].mxu1 }
 0x93a   :  { %v801_v17 = vpop.f32.mrb[22].mxu1 }
 0x93b   :  { %v804_v18 = vadd.f32 %v799_v15, %v731_v3  ;;  %v1205_v19 = vpop.f32.mrb[23].mxu1 }
 0x93d   :  { %806 = vst.msk [vmem:[#allocation2 + $0x50] sm:$0xff] %vm77_vm1, %v804_v18 }
 0x944   :  { %v807_v20 = vld [vmem:[#allocation2 + $0x50] sm:$0xff] }
 0x945   :  { %808 = vst.msk [vmem:[#allocation3] sm:$0xff] %vm77_vm1, %v807_v20  ;;  %860 = vst.msk [vmem:[#allocation3 + $0x50] sm:$0xff] %vm77_vm1, %v807_v20 }
 0x94c   :  { %v861_v23 = vld [vmem:[#allocation3] sm:$0xff]  ;;  %v871_v36 = vld [vmem:[#allocation3 + $0x50] sm:$0xff] }
 0x94d   :  { %v872_v25 = vpack.c.bf16 %v862_v21, %v861_v23  ;;  %v877_v37 = vpack.c.bf16 %v871_v36, %v871_v36 }
 0x94f   :  { %1210 = vmatprep.mubr.msk.bf16.mxu0 %vm77_vm1, %v872_v25 }
 0x950   :  { %1211 = vmatmul.mubr.msk.bf16.vlgmr.msra.gmra.mrb[16].mxu0 %vm77_vm1, %v873_v27 }
 0x951   :  { %1214 = vmatprep.mubr.msk.bf16.mxu0 %vm77_vm1, %v874_v29 }
 0x958   :  { %1215 = vmatmul.mubr.msk.bf16.gmra.mrb[20].mxu0 %vm77_vm1, %v875_v33 }
 0x959   :  { %1218 = vmatprep.mubr.msk.bf16.mxu0 %vm77_vm1, %v876_v35 }
 0x960   :  { %1219 = vmatmul.mubr.msk.bf16.gmra.mrb[24].mxu0 %vm77_vm1, %v877_v37 }
 0xa23   :  { %v1212_v39 = vpop.f32.mrb[16].mxu0 }
 0xa24   :  { %v962_v40 = vadd.f32 %v1212_v39, %v1070_v38  ;;  %v953_v41 = vpop.f32.mrb[17].mxu0 }
 0xa25   :  { %v954_v42 = vadd.f32 %v1070_v38, %v953_v41  ;;  %v1213_v43 = vpop.f32.mrb[18].mxu0 }
 0xa26   :  { %1079 = vst [vmem:[%s1587_s6 + $0x8] sm:$0xff] %v962_v40  ;;  %v965_v44 = vadd.f32 %v1213_v43, %v1070_v38  ;;  %v956_v45 = vpop.f32.mrb[19].mxu0 }
 0xa27   :  { %999 = vst [vmem:[%s1586_s5] sm:$0xff] %v954_v42  ;;  %v957_v46 = vadd.f32 %v1070_v38, %v956_v45 }
 0xa28   :  { %1080 = vst [vmem:[%s1587_s6 + $0x10] sm:$0xff] %v965_v44 }
 0xa29   :  { %1000 = vst [vmem:[%s1587_s6] sm:$0xff] %v957_v46 }
 0xa2b   :  { %v1216_v47 = vpop.f32.mrb[20].mxu0 }
 0xa2c   :  { %v978_v48 = vadd.f32 %v1216_v47, %v1070_v38  ;;  %v969_v49 = vpop.f32.mrb[21].mxu0 }
 0xa2d   :  { %v970_v50 = vadd.f32 %v1070_v38, %v969_v49  ;;  %v1217_v51 = vpop.f32.mrb[22].mxu0 }
 0xa2e   :  { %1083 = vst [vmem:[%s1587_s6 + $0x28] sm:$0xff] %v978_v48  ;;  %v981_v52 = vadd.f32 %v1217_v51, %v1070_v38  ;;  %v972_v53 = vpop.f32.mrb[23].mxu0 }
 0xa2f   :  { %1081 = vst [vmem:[%s1587_s6 + $0x18] sm:$0xff] %v970_v50  ;;  %v973_v54 = vadd.f32 %v1070_v38, %v972_v53 }
 0xa30   :  { %1084 = vst [vmem:[%s1587_s6 + $0x30] sm:$0xff] %v981_v52 }
 0xa31   :  { %1082 = vst [vmem:[%s1587_s6 + $0x20] sm:$0xff] %v973_v54 }
 0xa33   :  { %v1220_v55 = vpop.f32.mrb[24].mxu0 }
 0xa34   :  { %v994_v56 = vadd.f32 %v1220_v55, %v1070_v38  ;;  %v985_v57 = vpop.f32.mrb[25].mxu0 }
 0xa35   :  { %v986_v58 = vadd.f32 %v1070_v38, %v985_v57  ;;  %v1221_v59 = vpop.f32.mrb[26].mxu0 }
 0xa36   :  { %1087 = vst [vmem:[%s1587_s6 + $0x48] sm:$0xff] %v994_v56  ;;  %v988_v60 = vpop.f32.mrb[27].mxu0 }
 0xa37   :  { %1085 = vst [vmem:[%s1587_s6 + $0x38] sm:$0xff] %v986_v58  ;;  %v989_v61 = vadd.f32 %v1070_v38, %v988_v60 }
 0xa39   :  { %1086 = vst [vmem:[%s1587_s6 + $0x40] sm:$0xff] %v989_v61 }
 0xa3a   :  { %1027 = vsyncpa [#allocation5], 1 }
 0xa3b   :  { %1028 = vsyncpa [#allocation7], 1 }
 0xa3c   :  { %1029 = vsyncpa [#allocation10], 1 }

</bundles_post_ra>
